<compile_context>
chip_gen: v7x
topology: tpu7x:2x2x1
jax: 0.10.0
libtpu: 0.0.40
codegen_flags: <defaults>
</compile_context>

<pallas_src>
import functools
import math

import jax
import jax.numpy as jnp
from jax import lax
from jax.experimental import pallas as pl
from jax.experimental.pallas import tpu as pltpu

# ----------------------------------------------------------------------------
# Small config consistent with ModelConfig / StandardTransformerBaseline
# ----------------------------------------------------------------------------
VOCAB = 64          # config.vocab_size (small for the test)
DIM = 32            # config.dim
N_LAYERS = 2        # config.n_layers
N_HEADS = 4         # config.n_heads
HEAD_DIM = DIM // N_HEADS
FFN_DIM = 4 * DIM   # dim_feedforward = dim * 4
MAX_SEQ = 16        # config.max_seq_len
BATCH = 2
SEQ = 8
LN_EPS = 1e-5

VPAD = 128          # vocab padded to a full lane width (lane-dense logits store)
assert FFN_DIM == VPAD  # slab-B packing below relies on this (both 128 lanes wide)

# ---------------- packed-parameter slab layout (row offsets) ----------------
# Slab A: width DIM (=32) f32, rows stacked along the sublane axis.
A_EMB = 0                         # (VPAD, DIM)  padded embedding table (lookup)
A_POS = A_EMB + VPAD              # (MAX_SEQ, DIM) positional embeddings
A_LNF = A_POS + MAX_SEQ           # 8-row block: row0 = lnf_w, row1 = lnf_b
A_LAYER0 = A_LNF + 8
A_WQ, A_WK, A_WV, A_WO = 0, DIM, 2 * DIM, 3 * DIM       # (DIM, DIM) each
A_W2 = 4 * DIM                    # (FFN_DIM, DIM)  ffn second weight (pre-T)
A_BIAS = 4 * DIM + FFN_DIM        # 16-row bias/LN block
A_LAYER_STRIDE = A_BIAS + 16
A_ROWS = A_LAYER0 + N_LAYERS * A_LAYER_STRIDE            # = 696

# rows inside the per-layer bias block
BQ, BK, BV, BO, LN1W, LN1B, LN2W, LN2B, B2F = range(9)

# Slab B: width VPAD (=128 = FFN_DIM) f32.
B_EMBT = 0                        # (DIM, VPAD) transposed padded embedding (logits)
B_LAYER0 = B_EMBT + DIM
B_W1 = 0                          # (DIM, FFN_DIM) ffn first weight (pre-T)
B_B1 = DIM                        # 8-row block, row 0 = ffn bias1
B_LAYER_STRIDE = DIM + 8
B_ROWS = B_LAYER0 + N_LAYERS * B_LAYER_STRIDE            # = 112


# ----------------------------------------------------------------------------
# Shared math helpers (pure jnp — usable inside the kernel and in the reference)
# ----------------------------------------------------------------------------
def _layer_norm(x, w, b):
    mu = jnp.mean(x, axis=-1, keepdims=True)
    xc = x - mu
    var = jnp.mean(xc * xc, axis=-1, keepdims=True)
    return xc * lax.rsqrt(var + LN_EPS) * w + b


def _gelu_tanh(x):
    # TODO(synk): torch's activation='gelu' is the exact erf GELU; the tanh
    # approximation (diff ~1e-3) is used to avoid relying on an erf lowering.
    c = 0.7978845608028654  # sqrt(2/pi)
    return 0.5 * x * (1.0 + jnp.tanh(c * (x + 0.044715 * x * x * x)))


# ----------------------------------------------------------------------------
# Pallas kernel: embedding + full transformer stack + final norm + tied logits
# ----------------------------------------------------------------------------
def _transformer_stack_kernel(ids_ref, a_ref, b_ref, logits_ref, *,
                              batch, seq, n_heads):
    dim = DIM
    head_dim = dim // n_heads
    bt = batch * seq

    # ---------------- fused embedding lookup (one-hot matmul) + pos add ------
    ids = ids_ref[...]                                            # (B*T, 1) i32
    iota = lax.broadcasted_iota(jnp.int32, (bt, VPAD), 1)
    onehot = jnp.where(ids == iota, 1.0, 0.0).astype(jnp.float32)  # (B*T, VPAD)
    emb_pad = a_ref[A_EMB:A_EMB + VPAD, :]                        # (VPAD, D)
    pos = a_ref[A_POS:A_POS + seq, :]                             # (T, D)
    x = jnp.dot(onehot, emb_pad, preferred_element_type=jnp.float32)
    x = (x.reshape(batch, seq, dim) + pos[None]).reshape(bt, dim)  # (B*T, D)

    for l in range(N_LAYERS):                   # static unroll over layers
        base = A_LAYER0 + l * A_LAYER_STRIDE
        wq = a_ref[base + A_WQ: base + A_WQ + dim, :]             # (D, D)
        wk = a_ref[base + A_WK: base + A_WK + dim, :]
        wv = a_ref[base + A_WV: base + A_WV + dim, :]
        wo = a_ref[base + A_WO: base + A_WO + dim, :]
        w2 = a_ref[base + A_W2: base + A_W2 + FFN_DIM, :]         # (FF, D)
        bias = a_ref[base + A_BIAS: base + A_BIAS + 16, :]        # (16, D)
        bbase = B_LAYER0 + l * B_LAYER_STRIDE
        w1 = b_ref[bbase + B_W1: bbase + B_W1 + dim, :]           # (D, FF)
        b1 = b_ref[bbase + B_B1: bbase + B_B1 + 1, :]             # (1, FF)

        # ---------------- multi-head self-attention ----------------
        # three lane-aligned projections; 1/sqrt(hd) already folded into wq/bq
        q = jnp.dot(x, wq, preferred_element_type=jnp.float32) + bias[BQ:BQ + 1, :]
        k = jnp.dot(x, wk, preferred_element_type=jnp.float32) + bias[BK:BK + 1, :]
        v = jnp.dot(x, wv, preferred_element_type=jnp.float32) + bias[BV:BV + 1, :]
        q3 = q.reshape(batch, seq, dim)          # free leading-dim split
        k3 = k.reshape(batch, seq, dim)
        v3 = v.reshape(batch, seq, dim)

        attn_out = None
        for h in range(n_heads):                 # static unroll over heads
            c0 = h * head_dim
            qh = q3[:, :, c0:c0 + head_dim]      # (B, T, hd)
            kh = k3[:, :, c0:c0 + head_dim]
            vh = v3[:, :, c0:c0 + head_dim]
            s = jnp.einsum('bqd,bkd->bqk', qh, kh,
                           preferred_element_type=jnp.float32)    # (B, T, T)
            m = jnp.max(s, axis=-1, keepdims=True)
            e = jnp.exp(s - m)
            p = e * (1.0 / jnp.sum(e, axis=-1, keepdims=True))     # exact softmax
            ctx = jnp.einsum('bqk,bkd->bqd', p, vh,
                             preferred_element_type=jnp.float32)   # (B, T, hd)
            ctx2 = ctx.reshape(bt, head_dim)     # free leading-dim merge
            # output projection folded per head (pre-transposed W_o row block)
            contrib = jnp.dot(ctx2, wo[c0:c0 + head_dim, :],
                              preferred_element_type=jnp.float32)  # (B*T, D)
            attn_out = contrib if attn_out is None else attn_out + contrib
        attn_out = attn_out + bias[BO:BO + 1, :]

        x = _layer_norm(x + attn_out, bias[LN1W:LN1W + 1, :],
                        bias[LN1B:LN1B + 1, :])                    # post-norm

        # ---------------- feed-forward (gelu) ----------------
        h1 = _gelu_tanh(jnp.dot(x, w1, preferred_element_type=jnp.float32) + b1)
        ff = jnp.dot(h1, w2, preferred_element_type=jnp.float32) + bias[B2F:B2F + 1, :]
        x = _layer_norm(x + ff, bias[LN2W:LN2W + 1, :], bias[LN2B:LN2B + 1, :])

    # ---------------- final norm + tied output projection (lane-dense) -------
    xn = _layer_norm(x, a_ref[A_LNF:A_LNF + 1, :], a_ref[A_LNF + 1:A_LNF + 2, :])
    emb_t = b_ref[B_EMBT:B_EMBT + dim, :]                          # (D, VPAD)
    logits_ref[...] = jnp.dot(xn, emb_t, preferred_element_type=jnp.float32)


# ----------------------------------------------------------------------------
# Wrapper-side parameter packing (pre-transpose / pre-split / pad; done once)
# ----------------------------------------------------------------------------
def pack_params(params):
    scale = 1.0 / math.sqrt(HEAD_DIM)
    emb = params['token_emb'].astype(jnp.float32)                  # (V, D)
    emb_pad = jnp.zeros((VPAD, DIM), jnp.float32).at[:VOCAB].set(emb)
    emb_pad_t = jnp.zeros((DIM, VPAD), jnp.float32).at[:, :VOCAB].set(emb.T)

    a_parts = [
        emb_pad,
        params['pos_emb'].astype(jnp.float32),                     # (MAX_SEQ, D)
        jnp.concatenate([params['lnf_w'], params['lnf_b'],
                         jnp.zeros((6, DIM), jnp.float32)], axis=0),
    ]
    b_parts = [emb_pad_t]

    for l in range(N_LAYERS):
        qkv_w = params['qkv_w'][l]                                  # (3D, D)
        qkv_b = params['qkv_b'][l]                                  # (1, 3D)
        wq = qkv_w[0 * DIM:1 * DIM].T * scale                       # scale folded
        wk = qkv_w[1 * DIM:2 * DIM].T
        wv = qkv_w[2 * DIM:3 * DIM].T
        wo = params['att_w'][l].T                                   # (D, D)
        w2 = params['ffn_w2'][l].T                                  # (FF, D)
        bias_block = jnp.concatenate([
            qkv_b[:, 0 * DIM:1 * DIM] * scale,                      # BQ
            qkv_b[:, 1 * DIM:2 * DIM],                              # BK
            qkv_b[:, 2 * DIM:3 * DIM],                              # BV
            params['att_b'][l],                                     # BO
            params['ln1_w'][l], params['ln1_b'][l],                 # LN1W, LN1B
            params['ln2_w'][l], params['ln2_b'][l],                 # LN2W, LN2B
            params['ffn_b2'][l],                                    # B2F
            jnp.zeros((16 - 9, DIM), jnp.float32),
        ], axis=0)
        a_parts += [wq, wk, wv, wo, w2, bias_block]

        w1 = params['ffn_w1'][l].T                                  # (D, FF)
        b1_block = jnp.concatenate(
            [params['ffn_b1'][l], jnp.zeros((7, FFN_DIM), jnp.float32)], axis=0)
        b_parts += [w1, b1_block]

    slab_a = jnp.concatenate(a_parts, axis=0)
    slab_b = jnp.concatenate(b_parts, axis=0)
    assert slab_a.shape == (A_ROWS, DIM)
    assert slab_b.shape == (B_ROWS, VPAD)
    return {'slab_a': slab_a, 'slab_b': slab_b}


# ----------------------------------------------------------------------------
# Forward wrapper
# ----------------------------------------------------------------------------
def transformer_forward(token_ids, packed):
    B, T = token_ids.shape
    ids2d = token_ids.reshape(B * T, 1).astype(jnp.int32)

    kernel = functools.partial(_transformer_stack_kernel,
                               batch=B, seq=T, n_heads=N_HEADS)
    vmem = pl.BlockSpec(memory_space=pltpu.MemorySpace.VMEM)
    logits_pad = pl.pallas_call(
        kernel,
        out_shape=jax.ShapeDtypeStruct((B * T, VPAD), jnp.float32),
        in_specs=[vmem, vmem, vmem],
        out_specs=vmem,
    )(ids2d, packed['slab_a'], packed['slab_b'])

    return logits_pad[:, :VOCAB].reshape(B, T, VOCAB)


# ----------------------------------------------------------------------------
# Pure-JAX reference (mirrors the PyTorch forward in eval mode)
# ----------------------------------------------------------------------------
def reference_forward(token_ids, params):
    B, T = token_ids.shape
    H, hd = N_HEADS, HEAD_DIM
    emb = params['token_emb']
    x = jnp.take(emb, token_ids, axis=0) + params['pos_emb'][:T][None]

    for l in range(N_LAYERS):
        qkv = x @ params['qkv_w'][l].T + params['qkv_b'][l][0]
        q, k, v = jnp.split(qkv, 3, axis=-1)

        def heads(t):
            return t.reshape(B, T, H, hd).transpose(0, 2, 1, 3)

        qh, kh, vh = heads(q), heads(k), heads(v)
        s = jnp.einsum('bhqd,bhkd->bhqk', qh, kh) / math.sqrt(hd)
        attn = jax.nn.softmax(s, axis=-1)
        ctx = jnp.einsum('bhqk,bhkd->bhqd', attn, vh)
        ctx = ctx.transpose(0, 2, 1, 3).reshape(B, T, DIM)
        attn_out = ctx @ params['att_w'][l].T + params['att_b'][l][0]
        x = _layer_norm(x + attn_out, params['ln1_w'][l][0], params['ln1_b'][l][0])

        h1 = _gelu_tanh(x @ params['ffn_w1'][l].T + params['ffn_b1'][l][0])
        ff = h1 @ params['ffn_w2'][l].T + params['ffn_b2'][l][0]
        x = _layer_norm(x + ff, params['ln2_w'][l][0], params['ln2_b'][l][0])

    x = _layer_norm(x, params['lnf_w'][0], params['lnf_b'][0])
    return x @ emb.T


# ----------------------------------------------------------------------------
if __name__ == "__main__":
    key = jax.random.PRNGKey(0)
    ks = list(jax.random.split(key, 20))

    def nrm(k, shape, s=0.02):
        return s * jax.random.normal(k, shape, jnp.float32)

    params = {
        'token_emb': nrm(ks[0], (VOCAB, DIM)),
        'pos_emb':   nrm(ks[1], (MAX_SEQ, DIM)),
        'qkv_w':  nrm(ks[2],  (N_LAYERS, 3 * DIM, DIM), 0.05),
        'qkv_b':  nrm(ks[3],  (N_LAYERS, 1, 3 * DIM), 0.02),
        'att_w':  nrm(ks[4],  (N_LAYERS, DIM, DIM), 0.05),
        'att_b':  nrm(ks[5],  (N_LAYERS, 1, DIM), 0.02),
        'ln1_w':  1.0 + nrm(ks[6], (N_LAYERS, 1, DIM), 0.1),
        'ln1_b':  nrm(ks[7],  (N_LAYERS, 1, DIM), 0.05),
        'ln2_w':  1.0 + nrm(ks[8], (N_LAYERS, 1, DIM), 0.1),
        'ln2_b':  nrm(ks[9],  (N_LAYERS, 1, DIM), 0.05),
        'ffn_w1': nrm(ks[10], (N_LAYERS, FFN_DIM, DIM), 0.05),
        'ffn_b1': nrm(ks[11], (N_LAYERS, 1, FFN_DIM), 0.02),
        'ffn_w2': nrm(ks[12], (N_LAYERS, DIM, FFN_DIM), 0.05),
        'ffn_b2': nrm(ks[13], (N_LAYERS, 1, DIM), 0.02),
        'lnf_w':  1.0 + nrm(ks[14], (1, DIM), 0.1),
        'lnf_b':  nrm(ks[15], (1, DIM), 0.05),
    }
    token_ids = jax.random.randint(ks[16], (BATCH, SEQ), 0, VOCAB, jnp.int32)

    packed = jax.tree_util.tree_map(jax.block_until_ready, pack_params(params))

    logits = jax.block_until_ready(jax.jit(transformer_forward)(token_ids, packed))
    ref = jax.block_until_ready(reference_forward(token_ids, params))

    assert logits.shape == (BATCH, SEQ, VOCAB)
    max_err = float(jnp.max(jnp.abs(logits - ref)))
    assert jnp.allclose(logits, ref, atol=1e-3, rtol=1e-3), max_err
    print("KERNEL_OK")
</pallas_src>

<mosaic_0001>
module attributes {stable_mosaic.version = 11 : i64} {
  func.func @_transformer_stack_kernel(%arg0: memref<16x1xi32, #tpu.memory_space<vmem>>, %arg1: memref<696x32xf32, #tpu.memory_space<vmem>>, %arg2: memref<112x128xf32, #tpu.memory_space<vmem>>, %arg3: memref<16x128xf32, #tpu.memory_space<vmem>>) attributes {dimension_semantics = [], scalar_prefetch = 0 : i64, scratch_operands = 0 : i64, tpu.core_type = #tpu.core_type<tc>} {
    %c0 = arith.constant 0 : index
    %c0_0 = arith.constant 0 : index
    %0 = vector.load %arg0[%c0, %c0_0] : memref<16x1xi32, #tpu.memory_space<vmem>>, vector<16x1xi32>
    %1 = tpu.iota {dimensions = array<i32: 1>} : vector<16x128xi32>
    %2 = vector.broadcast %0 : vector<16x1xi32> to vector<16x128xi32>
    %3 = arith.cmpi eq, %2, %1 : vector<16x128xi32>
    %cst = arith.constant 1.000000e+00 : f32
    %cst_1 = arith.constant 0.000000e+00 : f32
    %4 = vector.broadcast %cst : f32 to vector<16x128xf32>
    %5 = vector.broadcast %cst_1 : f32 to vector<16x128xf32>
    %6 = arith.select %3, %4, %5 : vector<16x128xi1>, vector<16x128xf32>
    %c0_2 = arith.constant 0 : index
    %c0_3 = arith.constant 0 : index
    %7 = vector.load %arg1[%c0_2, %c0_3] : memref<696x32xf32, #tpu.memory_space<vmem>>, vector<128x32xf32>
    %c128 = arith.constant 128 : index
    %c0_4 = arith.constant 0 : index
    %8 = vector.load %arg1[%c128, %c0_4] : memref<696x32xf32, #tpu.memory_space<vmem>>, vector<8x32xf32>
    %cst_5 = arith.constant dense<0.000000e+00> : vector<16x32xf32>
    %9 = tpu.matmul %6, %7, %cst_5 {dimension_numbers = #tpu.dot_dimension_numbers<[1], [0], [0], [1], [0, 0, 1, 1], [], []>} : vector<16x128xf32>, vector<128x32xf32>, vector<16x32xf32> -> vector<16x32xf32>
    %10 = vector.shape_cast %9 : vector<16x32xf32> to vector<2x8x32xf32>
    %11 = vector.shape_cast %8 : vector<8x32xf32> to vector<1x8x32xf32>
    %12 = vector.broadcast %11 : vector<1x8x32xf32> to vector<2x8x32xf32>
    %13 = arith.addf %10, %12 : vector<2x8x32xf32>
    %14 = vector.shape_cast %13 : vector<2x8x32xf32> to vector<16x32xf32>
    %c152 = arith.constant 152 : index
    %c0_6 = arith.constant 0 : index
    %15 = vector.load %arg1[%c152, %c0_6] : memref<696x32xf32, #tpu.memory_space<vmem>>, vector<32x32xf32>
    %c184 = arith.constant 184 : index
    %c0_7 = arith.constant 0 : index
    %16 = vector.load %arg1[%c184, %c0_7] : memref<696x32xf32, #tpu.memory_space<vmem>>, vector<32x32xf32>
    %c216 = arith.constant 216 : index
    %c0_8 = arith.constant 0 : index
    %17 = vector.load %arg1[%c216, %c0_8] : memref<696x32xf32, #tpu.memory_space<vmem>>, vector<32x32xf32>
    %c248 = arith.constant 248 : index
    %c0_9 = arith.constant 0 : index
    %18 = vector.load %arg1[%c248, %c0_9] : memref<696x32xf32, #tpu.memory_space<vmem>>, vector<32x32xf32>
    %c280 = arith.constant 280 : index
    %c0_10 = arith.constant 0 : index
    %19 = vector.load %arg1[%c280, %c0_10] : memref<696x32xf32, #tpu.memory_space<vmem>>, vector<128x32xf32>
    %c408 = arith.constant 408 : index
    %c0_11 = arith.constant 0 : index
    %20 = vector.load %arg1[%c408, %c0_11] : memref<696x32xf32, #tpu.memory_space<vmem>>, vector<16x32xf32>
    %c32 = arith.constant 32 : index
    %c0_12 = arith.constant 0 : index
    %21 = vector.load %arg2[%c32, %c0_12] : memref<112x128xf32, #tpu.memory_space<vmem>>, vector<32x128xf32>
    %c64 = arith.constant 64 : index
    %c0_13 = arith.constant 0 : index
    %22 = vector.load %arg2[%c64, %c0_13] : memref<112x128xf32, #tpu.memory_space<vmem>>, vector<1x128xf32>
    %cst_14 = arith.constant dense<0.000000e+00> : vector<16x32xf32>
    %23 = tpu.matmul %14, %15, %cst_14 {dimension_numbers = #tpu.dot_dimension_numbers<[1], [0], [0], [1], [0, 0, 1, 1], [], []>} : vector<16x32xf32>, vector<32x32xf32>, vector<16x32xf32> -> vector<16x32xf32>
    %24 = vector.extract_strided_slice %20 {offsets = [0, 0], sizes = [1, 32], strides = [1, 1]} : vector<16x32xf32> to vector<1x32xf32>
    %25 = vector.broadcast %24 : vector<1x32xf32> to vector<16x32xf32>
    %26 = arith.addf %23, %25 : vector<16x32xf32>
    %cst_15 = arith.constant dense<0.000000e+00> : vector<16x32xf32>
    %27 = tpu.matmul %14, %16, %cst_15 {dimension_numbers = #tpu.dot_dimension_numbers<[1], [0], [0], [1], [0, 0, 1, 1], [], []>} : vector<16x32xf32>, vector<32x32xf32>, vector<16x32xf32> -> vector<16x32xf32>
    %28 = vector.extract_strided_slice %20 {offsets = [1, 0], sizes = [1, 32], strides = [1, 1]} : vector<16x32xf32> to vector<1x32xf32>
    %29 = vector.broadcast %28 : vector<1x32xf32> to vector<16x32xf32>
    %30 = arith.addf %27, %29 : vector<16x32xf32>
    %cst_16 = arith.constant dense<0.000000e+00> : vector<16x32xf32>
    %31 = tpu.matmul %14, %17, %cst_16 {dimension_numbers = #tpu.dot_dimension_numbers<[1], [0], [0], [1], [0, 0, 1, 1], [], []>} : vector<16x32xf32>, vector<32x32xf32>, vector<16x32xf32> -> vector<16x32xf32>
    %32 = vector.extract_strided_slice %20 {offsets = [2, 0], sizes = [1, 32], strides = [1, 1]} : vector<16x32xf32> to vector<1x32xf32>
    %33 = vector.broadcast %32 : vector<1x32xf32> to vector<16x32xf32>
    %34 = arith.addf %31, %33 : vector<16x32xf32>
    %35 = vector.shape_cast %26 : vector<16x32xf32> to vector<2x8x32xf32>
    %36 = vector.shape_cast %30 : vector<16x32xf32> to vector<2x8x32xf32>
    %37 = vector.shape_cast %34 : vector<16x32xf32> to vector<2x8x32xf32>
    %38 = vector.extract_strided_slice %35 {offsets = [0, 0, 0], sizes = [2, 8, 8], strides = [1, 1, 1]} : vector<2x8x32xf32> to vector<2x8x8xf32>
    %39 = vector.extract_strided_slice %36 {offsets = [0, 0, 0], sizes = [2, 8, 8], strides = [1, 1, 1]} : vector<2x8x32xf32> to vector<2x8x8xf32>
    %40 = vector.extract_strided_slice %37 {offsets = [0, 0, 0], sizes = [2, 8, 8], strides = [1, 1, 1]} : vector<2x8x32xf32> to vector<2x8x8xf32>
    "tpu.trace_start"() <{level = 10 : i32, message = "bqd,bkd->bqk"}> : () -> ()
    %cst_17 = arith.constant dense<0.000000e+00> : vector<2x8x8xf32>
    %41 = tpu.matmul %38, %39, %cst_17 {dimension_numbers = #tpu.dot_dimension_numbers<[2], [2], [1], [1], [0, 0, 0, 1, 1, 1], [0], [0]>} : vector<2x8x8xf32>, vector<2x8x8xf32>, vector<2x8x8xf32> -> vector<2x8x8xf32>
    "tpu.trace_stop"() : () -> ()
    %cst_18 = arith.constant dense<0xFF800000> : vector<2x8xf32>
    %42 = vector.multi_reduction <maximumf>, %41, %cst_18 [2] : vector<2x8x8xf32> to vector<2x8xf32>
    %43 = vector.shape_cast %42 : vector<2x8xf32> to vector<2x8x1xf32>
    %44 = vector.broadcast %43 : vector<2x8x1xf32> to vector<2x8x8xf32>
    %45 = arith.subf %41, %44 : vector<2x8x8xf32>
    %46 = math.exp %45 : vector<2x8x8xf32>
    %cst_19 = arith.constant dense<0.000000e+00> : vector<2x8xf32>
    %47 = vector.multi_reduction <add>, %46, %cst_19 [2] : vector<2x8x8xf32> to vector<2x8xf32>
    %48 = vector.shape_cast %47 : vector<2x8xf32> to vector<2x8x1xf32>
    %cst_20 = arith.constant 1.000000e+00 : f32
    %49 = vector.broadcast %cst_20 : f32 to vector<2x8x1xf32>
    %50 = arith.divf %49, %48 : vector<2x8x1xf32>
    %51 = vector.broadcast %50 : vector<2x8x1xf32> to vector<2x8x8xf32>
    %52 = arith.mulf %46, %51 : vector<2x8x8xf32>
    "tpu.trace_start"() <{level = 10 : i32, message = "bqk,bkd->bqd"}> : () -> ()
    %cst_21 = arith.constant dense<0.000000e+00> : vector<2x8x8xf32>
    %53 = tpu.matmul %52, %40, %cst_21 {dimension_numbers = #tpu.dot_dimension_numbers<[2], [1], [1], [2], [0, 0, 0, 1, 1, 2], [0], [0]>} : vector<2x8x8xf32>, vector<2x8x8xf32>, vector<2x8x8xf32> -> vector<2x8x8xf32>
    "tpu.trace_stop"() : () -> ()
    %54 = vector.shape_cast %53 : vector<2x8x8xf32> to vector<16x8xf32>
    %55 = vector.extract_strided_slice %18 {offsets = [0, 0], sizes = [8, 32], strides = [1, 1]} : vector<32x32xf32> to vector<8x32xf32>
    %cst_22 = arith.constant dense<0.000000e+00> : vector<16x32xf32>
    %56 = tpu.matmul %54, %55, %cst_22 {dimension_numbers = #tpu.dot_dimension_numbers<[1], [0], [0], [1], [0, 0, 1, 1], [], []>} : vector<16x8xf32>, vector<8x32xf32>, vector<16x32xf32> -> vector<16x32xf32>
    %57 = vector.extract_strided_slice %35 {offsets = [0, 0, 8], sizes = [2, 8, 8], strides = [1, 1, 1]} : vector<2x8x32xf32> to vector<2x8x8xf32>
    %58 = vector.extract_strided_slice %36 {offsets = [0, 0, 8], sizes = [2, 8, 8], strides = [1, 1, 1]} : vector<2x8x32xf32> to vector<2x8x8xf32>
    %59 = vector.extract_strided_slice %37 {offsets = [0, 0, 8], sizes = [2, 8, 8], strides = [1, 1, 1]} : vector<2x8x32xf32> to vector<2x8x8xf32>
    "tpu.trace_start"() <{level = 10 : i32, message = "bqd,bkd->bqk"}> : () -> ()
    %cst_23 = arith.constant dense<0.000000e+00> : vector<2x8x8xf32>
    %60 = tpu.matmul %57, %58, %cst_23 {dimension_numbers = #tpu.dot_dimension_numbers<[2], [2], [1], [1], [0, 0, 0, 1, 1, 1], [0], [0]>} : vector<2x8x8xf32>, vector<2x8x8xf32>, vector<2x8x8xf32> -> vector<2x8x8xf32>
    "tpu.trace_stop"() : () -> ()
    %cst_24 = arith.constant dense<0xFF800000> : vector<2x8xf32>
    %61 = vector.multi_reduction <maximumf>, %60, %cst_24 [2] : vector<2x8x8xf32> to vector<2x8xf32>
    %62 = vector.shape_cast %61 : vector<2x8xf32> to vector<2x8x1xf32>
    %63 = vector.broadcast %62 : vector<2x8x1xf32> to vector<2x8x8xf32>
    %64 = arith.subf %60, %63 : vector<2x8x8xf32>
    %65 = math.exp %64 : vector<2x8x8xf32>
    %cst_25 = arith.constant dense<0.000000e+00> : vector<2x8xf32>
    %66 = vector.multi_reduction <add>, %65, %cst_25 [2] : vector<2x8x8xf32> to vector<2x8xf32>
    %67 = vector.shape_cast %66 : vector<2x8xf32> to vector<2x8x1xf32>
    %cst_26 = arith.constant 1.000000e+00 : f32
    %68 = vector.broadcast %cst_26 : f32 to vector<2x8x1xf32>
    %69 = arith.divf %68, %67 : vector<2x8x1xf32>
    %70 = vector.broadcast %69 : vector<2x8x1xf32> to vector<2x8x8xf32>
    %71 = arith.mulf %65, %70 : vector<2x8x8xf32>
    "tpu.trace_start"() <{level = 10 : i32, message = "bqk,bkd->bqd"}> : () -> ()
    %cst_27 = arith.constant dense<0.000000e+00> : vector<2x8x8xf32>
    %72 = tpu.matmul %71, %59, %cst_27 {dimension_numbers = #tpu.dot_dimension_numbers<[2], [1], [1], [2], [0, 0, 0, 1, 1, 2], [0], [0]>} : vector<2x8x8xf32>, vector<2x8x8xf32>, vector<2x8x8xf32> -> vector<2x8x8xf32>
    "tpu.trace_stop"() : () -> ()
    %73 = vector.shape_cast %72 : vector<2x8x8xf32> to vector<16x8xf32>
    %74 = vector.extract_strided_slice %18 {offsets = [8, 0], sizes = [8, 32], strides = [1, 1]} : vector<32x32xf32> to vector<8x32xf32>
    %cst_28 = arith.constant dense<0.000000e+00> : vector<16x32xf32>
    %75 = tpu.matmul %73, %74, %cst_28 {dimension_numbers = #tpu.dot_dimension_numbers<[1], [0], [0], [1], [0, 0, 1, 1], [], []>} : vector<16x8xf32>, vector<8x32xf32>, vector<16x32xf32> -> vector<16x32xf32>
    %76 = arith.addf %56, %75 : vector<16x32xf32>
    %77 = vector.extract_strided_slice %35 {offsets = [0, 0, 16], sizes = [2, 8, 8], strides = [1, 1, 1]} : vector<2x8x32xf32> to vector<2x8x8xf32>
    %78 = vector.extract_strided_slice %36 {offsets = [0, 0, 16], sizes = [2, 8, 8], strides = [1, 1, 1]} : vector<2x8x32xf32> to vector<2x8x8xf32>
    %79 = vector.extract_strided_slice %37 {offsets = [0, 0, 16], sizes = [2, 8, 8], strides = [1, 1, 1]} : vector<2x8x32xf32> to vector<2x8x8xf32>
    "tpu.trace_start"() <{level = 10 : i32, message = "bqd,bkd->bqk"}> : () -> ()
    %cst_29 = arith.constant dense<0.000000e+00> : vector<2x8x8xf32>
    %80 = tpu.matmul %77, %78, %cst_29 {dimension_numbers = #tpu.dot_dimension_numbers<[2], [2], [1], [1], [0, 0, 0, 1, 1, 1], [0], [0]>} : vector<2x8x8xf32>, vector<2x8x8xf32>, vector<2x8x8xf32> -> vector<2x8x8xf32>
    "tpu.trace_stop"() : () -> ()
    %cst_30 = arith.constant dense<0xFF800000> : vector<2x8xf32>
    %81 = vector.multi_reduction <maximumf>, %80, %cst_30 [2] : vector<2x8x8xf32> to vector<2x8xf32>
    %82 = vector.shape_cast %81 : vector<2x8xf32> to vector<2x8x1xf32>
    %83 = vector.broadcast %82 : vector<2x8x1xf32> to vector<2x8x8xf32>
    %84 = arith.subf %80, %83 : vector<2x8x8xf32>
    %85 = math.exp %84 : vector<2x8x8xf32>
    %cst_31 = arith.constant dense<0.000000e+00> : vector<2x8xf32>
    %86 = vector.multi_reduction <add>, %85, %cst_31 [2] : vector<2x8x8xf32> to vector<2x8xf32>
    %87 = vector.shape_cast %86 : vector<2x8xf32> to vector<2x8x1xf32>
    %cst_32 = arith.constant 1.000000e+00 : f32
    %88 = vector.broadcast %cst_32 : f32 to vector<2x8x1xf32>
    %89 = arith.divf %88, %87 : vector<2x8x1xf32>
    %90 = vector.broadcast %89 : vector<2x8x1xf32> to vector<2x8x8xf32>
    %91 = arith.mulf %85, %90 : vector<2x8x8xf32>
    "tpu.trace_start"() <{level = 10 : i32, message = "bqk,bkd->bqd"}> : () -> ()
    %cst_33 = arith.constant dense<0.000000e+00> : vector<2x8x8xf32>
    %92 = tpu.matmul %91, %79, %cst_33 {dimension_numbers = #tpu.dot_dimension_numbers<[2], [1], [1], [2], [0, 0, 0, 1, 1, 2], [0], [0]>} : vector<2x8x8xf32>, vector<2x8x8xf32>, vector<2x8x8xf32> -> vector<2x8x8xf32>
    "tpu.trace_stop"() : () -> ()
    %93 = vector.shape_cast %92 : vector<2x8x8xf32> to vector<16x8xf32>
    %94 = vector.extract_strided_slice %18 {offsets = [16, 0], sizes = [8, 32], strides = [1, 1]} : vector<32x32xf32> to vector<8x32xf32>
    %cst_34 = arith.constant dense<0.000000e+00> : vector<16x32xf32>
    %95 = tpu.matmul %93, %94, %cst_34 {dimension_numbers = #tpu.dot_dimension_numbers<[1], [0], [0], [1], [0, 0, 1, 1], [], []>} : vector<16x8xf32>, vector<8x32xf32>, vector<16x32xf32> -> vector<16x32xf32>
    %96 = arith.addf %76, %95 : vector<16x32xf32>
    %97 = vector.extract_strided_slice %35 {offsets = [0, 0, 24], sizes = [2, 8, 8], strides = [1, 1, 1]} : vector<2x8x32xf32> to vector<2x8x8xf32>
    %98 = vector.extract_strided_slice %36 {offsets = [0, 0, 24], sizes = [2, 8, 8], strides = [1, 1, 1]} : vector<2x8x32xf32> to vector<2x8x8xf32>
    %99 = vector.extract_strided_slice %37 {offsets = [0, 0, 24], sizes = [2, 8, 8], strides = [1, 1, 1]} : vector<2x8x32xf32> to vector<2x8x8xf32>
    "tpu.trace_start"() <{level = 10 : i32, message = "bqd,bkd->bqk"}> : () -> ()
    %cst_35 = arith.constant dense<0.000000e+00> : vector<2x8x8xf32>
    %100 = tpu.matmul %97, %98, %cst_35 {dimension_numbers = #tpu.dot_dimension_numbers<[2], [2], [1], [1], [0, 0, 0, 1, 1, 1], [0], [0]>} : vector<2x8x8xf32>, vector<2x8x8xf32>, vector<2x8x8xf32> -> vector<2x8x8xf32>
    "tpu.trace_stop"() : () -> ()
    %cst_36 = arith.constant dense<0xFF800000> : vector<2x8xf32>
    %101 = vector.multi_reduction <maximumf>, %100, %cst_36 [2] : vector<2x8x8xf32> to vector<2x8xf32>
    %102 = vector.shape_cast %101 : vector<2x8xf32> to vector<2x8x1xf32>
    %103 = vector.broadcast %102 : vector<2x8x1xf32> to vector<2x8x8xf32>
    %104 = arith.subf %100, %103 : vector<2x8x8xf32>
    %105 = math.exp %104 : vector<2x8x8xf32>
    %cst_37 = arith.constant dense<0.000000e+00> : vector<2x8xf32>
    %106 = vector.multi_reduction <add>, %105, %cst_37 [2] : vector<2x8x8xf32> to vector<2x8xf32>
    %107 = vector.shape_cast %106 : vector<2x8xf32> to vector<2x8x1xf32>
    %cst_38 = arith.constant 1.000000e+00 : f32
    %108 = vector.broadcast %cst_38 : f32 to vector<2x8x1xf32>
    %109 = arith.divf %108, %107 : vector<2x8x1xf32>
    %110 = vector.broadcast %109 : vector<2x8x1xf32> to vector<2x8x8xf32>
    %111 = arith.mulf %105, %110 : vector<2x8x8xf32>
    "tpu.trace_start"() <{level = 10 : i32, message = "bqk,bkd->bqd"}> : () -> ()
    %cst_39 = arith.constant dense<0.000000e+00> : vector<2x8x8xf32>
    %112 = tpu.matmul %111, %99, %cst_39 {dimension_numbers = #tpu.dot_dimension_numbers<[2], [1], [1], [2], [0, 0, 0, 1, 1, 2], [0], [0]>} : vector<2x8x8xf32>, vector<2x8x8xf32>, vector<2x8x8xf32> -> vector<2x8x8xf32>
    "tpu.trace_stop"() : () -> ()
    %113 = vector.shape_cast %112 : vector<2x8x8xf32> to vector<16x8xf32>
    %114 = vector.extract_strided_slice %18 {offsets = [24, 0], sizes = [8, 32], strides = [1, 1]} : vector<32x32xf32> to vector<8x32xf32>
    %cst_40 = arith.constant dense<0.000000e+00> : vector<16x32xf32>
    %115 = tpu.matmul %113, %114, %cst_40 {dimension_numbers = #tpu.dot_dimension_numbers<[1], [0], [0], [1], [0, 0, 1, 1], [], []>} : vector<16x8xf32>, vector<8x32xf32>, vector<16x32xf32> -> vector<16x32xf32>
    %116 = arith.addf %96, %115 : vector<16x32xf32>
    %117 = vector.extract_strided_slice %20 {offsets = [3, 0], sizes = [1, 32], strides = [1, 1]} : vector<16x32xf32> to vector<1x32xf32>
    %118 = vector.broadcast %117 : vector<1x32xf32> to vector<16x32xf32>
    %119 = arith.addf %116, %118 : vector<16x32xf32>
    %120 = arith.addf %14, %119 : vector<16x32xf32>
    %121 = vector.extract_strided_slice %20 {offsets = [4, 0], sizes = [1, 32], strides = [1, 1]} : vector<16x32xf32> to vector<1x32xf32>
    %122 = vector.extract_strided_slice %20 {offsets = [5, 0], sizes = [1, 32], strides = [1, 1]} : vector<16x32xf32> to vector<1x32xf32>
    %cst_41 = arith.constant dense<0.000000e+00> : vector<16xf32>
    %123 = vector.multi_reduction <add>, %120, %cst_41 [1] : vector<16x32xf32> to vector<16xf32>
    %124 = vector.shape_cast %123 : vector<16xf32> to vector<16x1xf32>
    %cst_42 = arith.constant 3.200000e+01 : f32
    %125 = vector.broadcast %cst_42 : f32 to vector<16x1xf32>
    %126 = arith.divf %124, %125 : vector<16x1xf32>
    %127 = vector.broadcast %126 : vector<16x1xf32> to vector<16x32xf32>
    %128 = arith.subf %120, %127 : vector<16x32xf32>
    %129 = arith.mulf %128, %128 : vector<16x32xf32>
    %cst_43 = arith.constant dense<0.000000e+00> : vector<16xf32>
    %130 = vector.multi_reduction <add>, %129, %cst_43 [1] : vector<16x32xf32> to vector<16xf32>
    %131 = vector.shape_cast %130 : vector<16xf32> to vector<16x1xf32>
    %cst_44 = arith.constant 3.200000e+01 : f32
    %132 = vector.broadcast %cst_44 : f32 to vector<16x1xf32>
    %133 = arith.divf %131, %132 : vector<16x1xf32>
    %cst_45 = arith.constant 9.99999974E-6 : f32
    %134 = vector.broadcast %cst_45 : f32 to vector<16x1xf32>
    %135 = arith.addf %133, %134 : vector<16x1xf32>
    %136 = math.rsqrt %135 : vector<16x1xf32>
    %137 = vector.broadcast %136 : vector<16x1xf32> to vector<16x32xf32>
    %138 = arith.mulf %128, %137 : vector<16x32xf32>
    %139 = vector.broadcast %121 : vector<1x32xf32> to vector<16x32xf32>
    %140 = arith.mulf %138, %139 : vector<16x32xf32>
    %141 = vector.broadcast %122 : vector<1x32xf32> to vector<16x32xf32>
    %142 = arith.addf %140, %141 : vector<16x32xf32>
    %cst_46 = arith.constant dense<0.000000e+00> : vector<16x128xf32>
    %143 = tpu.matmul %142, %21, %cst_46 {dimension_numbers = #tpu.dot_dimension_numbers<[1], [0], [0], [1], [0, 0, 1, 1], [], []>} : vector<16x32xf32>, vector<32x128xf32>, vector<16x128xf32> -> vector<16x128xf32>
    %144 = vector.broadcast %22 : vector<1x128xf32> to vector<16x128xf32>
    %145 = arith.addf %143, %144 : vector<16x128xf32>
    %cst_47 = arith.constant 5.000000e-01 : f32
    %146 = vector.broadcast %cst_47 : f32 to vector<16x128xf32>
    %147 = arith.mulf %146, %145 : vector<16x128xf32>
    %cst_48 = arith.constant 4.471500e-02 : f32
    %148 = vector.broadcast %cst_48 : f32 to vector<16x128xf32>
    %149 = arith.mulf %148, %145 : vector<16x128xf32>
    %150 = arith.mulf %149, %145 : vector<16x128xf32>
    %151 = arith.mulf %150, %145 : vector<16x128xf32>
    %152 = arith.addf %145, %151 : vector<16x128xf32>
    %cst_49 = arith.constant 0.797884583 : f32
    %153 = vector.broadcast %cst_49 : f32 to vector<16x128xf32>
    %154 = arith.mulf %153, %152 : vector<16x128xf32>
    %155 = math.tanh %154 : vector<16x128xf32>
    %cst_50 = arith.constant 1.000000e+00 : f32
    %156 = vector.broadcast %cst_50 : f32 to vector<16x128xf32>
    %157 = arith.addf %156, %155 : vector<16x128xf32>
    %158 = arith.mulf %147, %157 : vector<16x128xf32>
    %cst_51 = arith.constant dense<0.000000e+00> : vector<16x32xf32>
    %159 = tpu.matmul %158, %19, %cst_51 {dimension_numbers = #tpu.dot_dimension_numbers<[1], [0], [0], [1], [0, 0, 1, 1], [], []>} : vector<16x128xf32>, vector<128x32xf32>, vector<16x32xf32> -> vector<16x32xf32>
    %160 = vector.extract_strided_slice %20 {offsets = [8, 0], sizes = [1, 32], strides = [1, 1]} : vector<16x32xf32> to vector<1x32xf32>
    %161 = vector.broadcast %160 : vector<1x32xf32> to vector<16x32xf32>
    %162 = arith.addf %159, %161 : vector<16x32xf32>
    %163 = arith.addf %142, %162 : vector<16x32xf32>
    %164 = vector.extract_strided_slice %20 {offsets = [6, 0], sizes = [1, 32], strides = [1, 1]} : vector<16x32xf32> to vector<1x32xf32>
    %165 = vector.extract_strided_slice %20 {offsets = [7, 0], sizes = [1, 32], strides = [1, 1]} : vector<16x32xf32> to vector<1x32xf32>
    %cst_52 = arith.constant dense<0.000000e+00> : vector<16xf32>
    %166 = vector.multi_reduction <add>, %163, %cst_52 [1] : vector<16x32xf32> to vector<16xf32>
    %167 = vector.shape_cast %166 : vector<16xf32> to vector<16x1xf32>
    %cst_53 = arith.constant 3.200000e+01 : f32
    %168 = vector.broadcast %cst_53 : f32 to vector<16x1xf32>
    %169 = arith.divf %167, %168 : vector<16x1xf32>
    %170 = vector.broadcast %169 : vector<16x1xf32> to vector<16x32xf32>
    %171 = arith.subf %163, %170 : vector<16x32xf32>
    %172 = arith.mulf %171, %171 : vector<16x32xf32>
    %cst_54 = arith.constant dense<0.000000e+00> : vector<16xf32>
    %173 = vector.multi_reduction <add>, %172, %cst_54 [1] : vector<16x32xf32> to vector<16xf32>
    %174 = vector.shape_cast %173 : vector<16xf32> to vector<16x1xf32>
    %cst_55 = arith.constant 3.200000e+01 : f32
    %175 = vector.broadcast %cst_55 : f32 to vector<16x1xf32>
    %176 = arith.divf %174, %175 : vector<16x1xf32>
    %cst_56 = arith.constant 9.99999974E-6 : f32
    %177 = vector.broadcast %cst_56 : f32 to vector<16x1xf32>
    %178 = arith.addf %176, %177 : vector<16x1xf32>
    %179 = math.rsqrt %178 : vector<16x1xf32>
    %180 = vector.broadcast %179 : vector<16x1xf32> to vector<16x32xf32>
    %181 = arith.mulf %171, %180 : vector<16x32xf32>
    %182 = vector.broadcast %164 : vector<1x32xf32> to vector<16x32xf32>
    %183 = arith.mulf %181, %182 : vector<16x32xf32>
    %184 = vector.broadcast %165 : vector<1x32xf32> to vector<16x32xf32>
    %185 = arith.addf %183, %184 : vector<16x32xf32>
    %c424 = arith.constant 424 : index
    %c0_57 = arith.constant 0 : index
    %186 = vector.load %arg1[%c424, %c0_57] : memref<696x32xf32, #tpu.memory_space<vmem>>, vector<32x32xf32>
    %c456 = arith.constant 456 : index
    %c0_58 = arith.constant 0 : index
    %187 = vector.load %arg1[%c456, %c0_58] : memref<696x32xf32, #tpu.memory_space<vmem>>, vector<32x32xf32>
    %c488 = arith.constant 488 : index
    %c0_59 = arith.constant 0 : index
    %188 = vector.load %arg1[%c488, %c0_59] : memref<696x32xf32, #tpu.memory_space<vmem>>, vector<32x32xf32>
    %c520 = arith.constant 520 : index
    %c0_60 = arith.constant 0 : index
    %189 = vector.load %arg1[%c520, %c0_60] : memref<696x32xf32, #tpu.memory_space<vmem>>, vector<32x32xf32>
    %c552 = arith.constant 552 : index
    %c0_61 = arith.constant 0 : index
    %190 = vector.load %arg1[%c552, %c0_61] : memref<696x32xf32, #tpu.memory_space<vmem>>, vector<128x32xf32>
    %c680 = arith.constant 680 : index
    %c0_62 = arith.constant 0 : index
    %191 = vector.load %arg1[%c680, %c0_62] : memref<696x32xf32, #tpu.memory_space<vmem>>, vector<16x32xf32>
    %c72 = arith.constant 72 : index
    %c0_63 = arith.constant 0 : index
    %192 = vector.load %arg2[%c72, %c0_63] : memref<112x128xf32, #tpu.memory_space<vmem>>, vector<32x128xf32>
    %c104 = arith.constant 104 : index
    %c0_64 = arith.constant 0 : index
    %193 = vector.load %arg2[%c104, %c0_64] : memref<112x128xf32, #tpu.memory_space<vmem>>, vector<1x128xf32>
    %cst_65 = arith.constant dense<0.000000e+00> : vector<16x32xf32>
    %194 = tpu.matmul %185, %186, %cst_65 {dimension_numbers = #tpu.dot_dimension_numbers<[1], [0], [0], [1], [0, 0, 1, 1], [], []>} : vector<16x32xf32>, vector<32x32xf32>, vector<16x32xf32> -> vector<16x32xf32>
    %195 = vector.extract_strided_slice %191 {offsets = [0, 0], sizes = [1, 32], strides = [1, 1]} : vector<16x32xf32> to vector<1x32xf32>
    %196 = vector.broadcast %195 : vector<1x32xf32> to vector<16x32xf32>
    %197 = arith.addf %194, %196 : vector<16x32xf32>
    %cst_66 = arith.constant dense<0.000000e+00> : vector<16x32xf32>
    %198 = tpu.matmul %185, %187, %cst_66 {dimension_numbers = #tpu.dot_dimension_numbers<[1], [0], [0], [1], [0, 0, 1, 1], [], []>} : vector<16x32xf32>, vector<32x32xf32>, vector<16x32xf32> -> vector<16x32xf32>
    %199 = vector.extract_strided_slice %191 {offsets = [1, 0], sizes = [1, 32], strides = [1, 1]} : vector<16x32xf32> to vector<1x32xf32>
    %200 = vector.broadcast %199 : vector<1x32xf32> to vector<16x32xf32>
    %201 = arith.addf %198, %200 : vector<16x32xf32>
    %cst_67 = arith.constant dense<0.000000e+00> : vector<16x32xf32>
    %202 = tpu.matmul %185, %188, %cst_67 {dimension_numbers = #tpu.dot_dimension_numbers<[1], [0], [0], [1], [0, 0, 1, 1], [], []>} : vector<16x32xf32>, vector<32x32xf32>, vector<16x32xf32> -> vector<16x32xf32>
    %203 = vector.extract_strided_slice %191 {offsets = [2, 0], sizes = [1, 32], strides = [1, 1]} : vector<16x32xf32> to vector<1x32xf32>
    %204 = vector.broadcast %203 : vector<1x32xf32> to vector<16x32xf32>
    %205 = arith.addf %202, %204 : vector<16x32xf32>
    %206 = vector.shape_cast %197 : vector<16x32xf32> to vector<2x8x32xf32>
    %207 = vector.shape_cast %201 : vector<16x32xf32> to vector<2x8x32xf32>
    %208 = vector.shape_cast %205 : vector<16x32xf32> to vector<2x8x32xf32>
    %209 = vector.extract_strided_slice %206 {offsets = [0, 0, 0], sizes = [2, 8, 8], strides = [1, 1, 1]} : vector<2x8x32xf32> to vector<2x8x8xf32>
    %210 = vector.extract_strided_slice %207 {offsets = [0, 0, 0], sizes = [2, 8, 8], strides = [1, 1, 1]} : vector<2x8x32xf32> to vector<2x8x8xf32>
    %211 = vector.extract_strided_slice %208 {offsets = [0, 0, 0], sizes = [2, 8, 8], strides = [1, 1, 1]} : vector<2x8x32xf32> to vector<2x8x8xf32>
    "tpu.trace_start"() <{level = 10 : i32, message = "bqd,bkd->bqk"}> : () -> ()
    %cst_68 = arith.constant dense<0.000000e+00> : vector<2x8x8xf32>
    %212 = tpu.matmul %209, %210, %cst_68 {dimension_numbers = #tpu.dot_dimension_numbers<[2], [2], [1], [1], [0, 0, 0, 1, 1, 1], [0], [0]>} : vector<2x8x8xf32>, vector<2x8x8xf32>, vector<2x8x8xf32> -> vector<2x8x8xf32>
    "tpu.trace_stop"() : () -> ()
    %cst_69 = arith.constant dense<0xFF800000> : vector<2x8xf32>
    %213 = vector.multi_reduction <maximumf>, %212, %cst_69 [2] : vector<2x8x8xf32> to vector<2x8xf32>
    %214 = vector.shape_cast %213 : vector<2x8xf32> to vector<2x8x1xf32>
    %215 = vector.broadcast %214 : vector<2x8x1xf32> to vector<2x8x8xf32>
    %216 = arith.subf %212, %215 : vector<2x8x8xf32>
    %217 = math.exp %216 : vector<2x8x8xf32>
    %cst_70 = arith.constant dense<0.000000e+00> : vector<2x8xf32>
    %218 = vector.multi_reduction <add>, %217, %cst_70 [2] : vector<2x8x8xf32> to vector<2x8xf32>
    %219 = vector.shape_cast %218 : vector<2x8xf32> to vector<2x8x1xf32>
    %cst_71 = arith.constant 1.000000e+00 : f32
    %220 = vector.broadcast %cst_71 : f32 to vector<2x8x1xf32>
    %221 = arith.divf %220, %219 : vector<2x8x1xf32>
    %222 = vector.broadcast %221 : vector<2x8x1xf32> to vector<2x8x8xf32>
    %223 = arith.mulf %217, %222 : vector<2x8x8xf32>
    "tpu.trace_start"() <{level = 10 : i32, message = "bqk,bkd->bqd"}> : () -> ()
    %cst_72 = arith.constant dense<0.000000e+00> : vector<2x8x8xf32>
    %224 = tpu.matmul %223, %211, %cst_72 {dimension_numbers = #tpu.dot_dimension_numbers<[2], [1], [1], [2], [0, 0, 0, 1, 1, 2], [0], [0]>} : vector<2x8x8xf32>, vector<2x8x8xf32>, vector<2x8x8xf32> -> vector<2x8x8xf32>
    "tpu.trace_stop"() : () -> ()
    %225 = vector.shape_cast %224 : vector<2x8x8xf32> to vector<16x8xf32>
    %226 = vector.extract_strided_slice %189 {offsets = [0, 0], sizes = [8, 32], strides = [1, 1]} : vector<32x32xf32> to vector<8x32xf32>
    %cst_73 = arith.constant dense<0.000000e+00> : vector<16x32xf32>
    %227 = tpu.matmul %225, %226, %cst_73 {dimension_numbers = #tpu.dot_dimension_numbers<[1], [0], [0], [1], [0, 0, 1, 1], [], []>} : vector<16x8xf32>, vector<8x32xf32>, vector<16x32xf32> -> vector<16x32xf32>
    %228 = vector.extract_strided_slice %206 {offsets = [0, 0, 8], sizes = [2, 8, 8], strides = [1, 1, 1]} : vector<2x8x32xf32> to vector<2x8x8xf32>
    %229 = vector.extract_strided_slice %207 {offsets = [0, 0, 8], sizes = [2, 8, 8], strides = [1, 1, 1]} : vector<2x8x32xf32> to vector<2x8x8xf32>
    %230 = vector.extract_strided_slice %208 {offsets = [0, 0, 8], sizes = [2, 8, 8], strides = [1, 1, 1]} : vector<2x8x32xf32> to vector<2x8x8xf32>
    "tpu.trace_start"() <{level = 10 : i32, message = "bqd,bkd->bqk"}> : () -> ()
    %cst_74 = arith.constant dense<0.000000e+00> : vector<2x8x8xf32>
    %231 = tpu.matmul %228, %229, %cst_74 {dimension_numbers = #tpu.dot_dimension_numbers<[2], [2], [1], [1], [0, 0, 0, 1, 1, 1], [0], [0]>} : vector<2x8x8xf32>, vector<2x8x8xf32>, vector<2x8x8xf32> -> vector<2x8x8xf32>
    "tpu.trace_stop"() : () -> ()
    %cst_75 = arith.constant dense<0xFF800000> : vector<2x8xf32>
    %232 = vector.multi_reduction <maximumf>, %231, %cst_75 [2] : vector<2x8x8xf32> to vector<2x8xf32>
    %233 = vector.shape_cast %232 : vector<2x8xf32> to vector<2x8x1xf32>
    %234 = vector.broadcast %233 : vector<2x8x1xf32> to vector<2x8x8xf32>
    %235 = arith.subf %231, %234 : vector<2x8x8xf32>
    %236 = math.exp %235 : vector<2x8x8xf32>
    %cst_76 = arith.constant dense<0.000000e+00> : vector<2x8xf32>
    %237 = vector.multi_reduction <add>, %236, %cst_76 [2] : vector<2x8x8xf32> to vector<2x8xf32>
    %238 = vector.shape_cast %237 : vector<2x8xf32> to vector<2x8x1xf32>
    %cst_77 = arith.constant 1.000000e+00 : f32
    %239 = vector.broadcast %cst_77 : f32 to vector<2x8x1xf32>
    %240 = arith.divf %239, %238 : vector<2x8x1xf32>
    %241 = vector.broadcast %240 : vector<2x8x1xf32> to vector<2x8x8xf32>
    %242 = arith.mulf %236, %241 : vector<2x8x8xf32>
    "tpu.trace_start"() <{level = 10 : i32, message = "bqk,bkd->bqd"}> : () -> ()
    %cst_78 = arith.constant dense<0.000000e+00> : vector<2x8x8xf32>
    %243 = tpu.matmul %242, %230, %cst_78 {dimension_numbers = #tpu.dot_dimension_numbers<[2], [1], [1], [2], [0, 0, 0, 1, 1, 2], [0], [0]>} : vector<2x8x8xf32>, vector<2x8x8xf32>, vector<2x8x8xf32> -> vector<2x8x8xf32>
    "tpu.trace_stop"() : () -> ()
    %244 = vector.shape_cast %243 : vector<2x8x8xf32> to vector<16x8xf32>
    %245 = vector.extract_strided_slice %189 {offsets = [8, 0], sizes = [8, 32], strides = [1, 1]} : vector<32x32xf32> to vector<8x32xf32>
    %cst_79 = arith.constant dense<0.000000e+00> : vector<16x32xf32>
    %246 = tpu.matmul %244, %245, %cst_79 {dimension_numbers = #tpu.dot_dimension_numbers<[1], [0], [0], [1], [0, 0, 1, 1], [], []>} : vector<16x8xf32>, vector<8x32xf32>, vector<16x32xf32> -> vector<16x32xf32>
    %247 = arith.addf %227, %246 : vector<16x32xf32>
    %248 = vector.extract_strided_slice %206 {offsets = [0, 0, 16], sizes = [2, 8, 8], strides = [1, 1, 1]} : vector<2x8x32xf32> to vector<2x8x8xf32>
    %249 = vector.extract_strided_slice %207 {offsets = [0, 0, 16], sizes = [2, 8, 8], strides = [1, 1, 1]} : vector<2x8x32xf32> to vector<2x8x8xf32>
    %250 = vector.extract_strided_slice %208 {offsets = [0, 0, 16], sizes = [2, 8, 8], strides = [1, 1, 1]} : vector<2x8x32xf32> to vector<2x8x8xf32>
    "tpu.trace_start"() <{level = 10 : i32, message = "bqd,bkd->bqk"}> : () -> ()
    %cst_80 = arith.constant dense<0.000000e+00> : vector<2x8x8xf32>
    %251 = tpu.matmul %248, %249, %cst_80 {dimension_numbers = #tpu.dot_dimension_numbers<[2], [2], [1], [1], [0, 0, 0, 1, 1, 1], [0], [0]>} : vector<2x8x8xf32>, vector<2x8x8xf32>, vector<2x8x8xf32> -> vector<2x8x8xf32>
    "tpu.trace_stop"() : () -> ()
    %cst_81 = arith.constant dense<0xFF800000> : vector<2x8xf32>
    %252 = vector.multi_reduction <maximumf>, %251, %cst_81 [2] : vector<2x8x8xf32> to vector<2x8xf32>
    %253 = vector.shape_cast %252 : vector<2x8xf32> to vector<2x8x1xf32>
    %254 = vector.broadcast %253 : vector<2x8x1xf32> to vector<2x8x8xf32>
    %255 = arith.subf %251, %254 : vector<2x8x8xf32>
    %256 = math.exp %255 : vector<2x8x8xf32>
    %cst_82 = arith.constant dense<0.000000e+00> : vector<2x8xf32>
    %257 = vector.multi_reduction <add>, %256, %cst_82 [2] : vector<2x8x8xf32> to vector<2x8xf32>
    %258 = vector.shape_cast %257 : vector<2x8xf32> to vector<2x8x1xf32>
    %cst_83 = arith.constant 1.000000e+00 : f32
    %259 = vector.broadcast %cst_83 : f32 to vector<2x8x1xf32>
    %260 = arith.divf %259, %258 : vector<2x8x1xf32>
    %261 = vector.broadcast %260 : vector<2x8x1xf32> to vector<2x8x8xf32>
    %262 = arith.mulf %256, %261 : vector<2x8x8xf32>
    "tpu.trace_start"() <{level = 10 : i32, message = "bqk,bkd->bqd"}> : () -> ()
    %cst_84 = arith.constant dense<0.000000e+00> : vector<2x8x8xf32>
    %263 = tpu.matmul %262, %250, %cst_84 {dimension_numbers = #tpu.dot_dimension_numbers<[2], [1], [1], [2], [0, 0, 0, 1, 1, 2], [0], [0]>} : vector<2x8x8xf32>, vector<2x8x8xf32>, vector<2x8x8xf32> -> vector<2x8x8xf32>
    "tpu.trace_stop"() : () -> ()
    %264 = vector.shape_cast %263 : vector<2x8x8xf32> to vector<16x8xf32>
    %265 = vector.extract_strided_slice %189 {offsets = [16, 0], sizes = [8, 32], strides = [1, 1]} : vector<32x32xf32> to vector<8x32xf32>
    %cst_85 = arith.constant dense<0.000000e+00> : vector<16x32xf32>
    %266 = tpu.matmul %264, %265, %cst_85 {dimension_numbers = #tpu.dot_dimension_numbers<[1], [0], [0], [1], [0, 0, 1, 1], [], []>} : vector<16x8xf32>, vector<8x32xf32>, vector<16x32xf32> -> vector<16x32xf32>
    %267 = arith.addf %247, %266 : vector<16x32xf32>
    %268 = vector.extract_strided_slice %206 {offsets = [0, 0, 24], sizes = [2, 8, 8], strides = [1, 1, 1]} : vector<2x8x32xf32> to vector<2x8x8xf32>
    %269 = vector.extract_strided_slice %207 {offsets = [0, 0, 24], sizes = [2, 8, 8], strides = [1, 1, 1]} : vector<2x8x32xf32> to vector<2x8x8xf32>
    %270 = vector.extract_strided_slice %208 {offsets = [0, 0, 24], sizes = [2, 8, 8], strides = [1, 1, 1]} : vector<2x8x32xf32> to vector<2x8x8xf32>
    "tpu.trace_start"() <{level = 10 : i32, message = "bqd,bkd->bqk"}> : () -> ()
    %cst_86 = arith.constant dense<0.000000e+00> : vector<2x8x8xf32>
    %271 = tpu.matmul %268, %269, %cst_86 {dimension_numbers = #tpu.dot_dimension_numbers<[2], [2], [1], [1], [0, 0, 0, 1, 1, 1], [0], [0]>} : vector<2x8x8xf32>, vector<2x8x8xf32>, vector<2x8x8xf32> -> vector<2x8x8xf32>
    "tpu.trace_stop"() : () -> ()
    %cst_87 = arith.constant dense<0xFF800000> : vector<2x8xf32>
    %272 = vector.multi_reduction <maximumf>, %271, %cst_87 [2] : vector<2x8x8xf32> to vector<2x8xf32>
    %273 = vector.shape_cast %272 : vector<2x8xf32> to vector<2x8x1xf32>
    %274 = vector.broadcast %273 : vector<2x8x1xf32> to vector<2x8x8xf32>
    %275 = arith.subf %271, %274 : vector<2x8x8xf32>
    %276 = math.exp %275 : vector<2x8x8xf32>
    %cst_88 = arith.constant dense<0.000000e+00> : vector<2x8xf32>
    %277 = vector.multi_reduction <add>, %276, %cst_88 [2] : vector<2x8x8xf32> to vector<2x8xf32>
    %278 = vector.shape_cast %277 : vector<2x8xf32> to vector<2x8x1xf32>
    %cst_89 = arith.constant 1.000000e+00 : f32
    %279 = vector.broadcast %cst_89 : f32 to vector<2x8x1xf32>
    %280 = arith.divf %279, %278 : vector<2x8x1xf32>
    %281 = vector.broadcast %280 : vector<2x8x1xf32> to vector<2x8x8xf32>
    %282 = arith.mulf %276, %281 : vector<2x8x8xf32>
    "tpu.trace_start"() <{level = 10 : i32, message = "bqk,bkd->bqd"}> : () -> ()
    %cst_90 = arith.constant dense<0.000000e+00> : vector<2x8x8xf32>
    %283 = tpu.matmul %282, %270, %cst_90 {dimension_numbers = #tpu.dot_dimension_numbers<[2], [1], [1], [2], [0, 0, 0, 1, 1, 2], [0], [0]>} : vector<2x8x8xf32>, vector<2x8x8xf32>, vector<2x8x8xf32> -> vector<2x8x8xf32>
    "tpu.trace_stop"() : () -> ()
    %284 = vector.shape_cast %283 : vector<2x8x8xf32> to vector<16x8xf32>
    %285 = vector.extract_strided_slice %189 {offsets = [24, 0], sizes = [8, 32], strides = [1, 1]} : vector<32x32xf32> to vector<8x32xf32>
    %cst_91 = arith.constant dense<0.000000e+00> : vector<16x32xf32>
    %286 = tpu.matmul %284, %285, %cst_91 {dimension_numbers = #tpu.dot_dimension_numbers<[1], [0], [0], [1], [0, 0, 1, 1], [], []>} : vector<16x8xf32>, vector<8x32xf32>, vector<16x32xf32> -> vector<16x32xf32>
    %287 = arith.addf %267, %286 : vector<16x32xf32>
    %288 = vector.extract_strided_slice %191 {offsets = [3, 0], sizes = [1, 32], strides = [1, 1]} : vector<16x32xf32> to vector<1x32xf32>
    %289 = vector.broadcast %288 : vector<1x32xf32> to vector<16x32xf32>
    %290 = arith.addf %287, %289 : vector<16x32xf32>
    %291 = arith.addf %185, %290 : vector<16x32xf32>
    %292 = vector.extract_strided_slice %191 {offsets = [4, 0], sizes = [1, 32], strides = [1, 1]} : vector<16x32xf32> to vector<1x32xf32>
    %293 = vector.extract_strided_slice %191 {offsets = [5, 0], sizes = [1, 32], strides = [1, 1]} : vector<16x32xf32> to vector<1x32xf32>
    %cst_92 = arith.constant dense<0.000000e+00> : vector<16xf32>
    %294 = vector.multi_reduction <add>, %291, %cst_92 [1] : vector<16x32xf32> to vector<16xf32>
    %295 = vector.shape_cast %294 : vector<16xf32> to vector<16x1xf32>
    %cst_93 = arith.constant 3.200000e+01 : f32
    %296 = vector.broadcast %cst_93 : f32 to vector<16x1xf32>
    %297 = arith.divf %295, %296 : vector<16x1xf32>
    %298 = vector.broadcast %297 : vector<16x1xf32> to vector<16x32xf32>
    %299 = arith.subf %291, %298 : vector<16x32xf32>
    %300 = arith.mulf %299, %299 : vector<16x32xf32>
    %cst_94 = arith.constant dense<0.000000e+00> : vector<16xf32>
    %301 = vector.multi_reduction <add>, %300, %cst_94 [1] : vector<16x32xf32> to vector<16xf32>
    %302 = vector.shape_cast %301 : vector<16xf32> to vector<16x1xf32>
    %cst_95 = arith.constant 3.200000e+01 : f32
    %303 = vector.broadcast %cst_95 : f32 to vector<16x1xf32>
    %304 = arith.divf %302, %303 : vector<16x1xf32>
    %cst_96 = arith.constant 9.99999974E-6 : f32
    %305 = vector.broadcast %cst_96 : f32 to vector<16x1xf32>
    %306 = arith.addf %304, %305 : vector<16x1xf32>
    %307 = math.rsqrt %306 : vector<16x1xf32>
    %308 = vector.broadcast %307 : vector<16x1xf32> to vector<16x32xf32>
    %309 = arith.mulf %299, %308 : vector<16x32xf32>
    %310 = vector.broadcast %292 : vector<1x32xf32> to vector<16x32xf32>
    %311 = arith.mulf %309, %310 : vector<16x32xf32>
    %312 = vector.broadcast %293 : vector<1x32xf32> to vector<16x32xf32>
    %313 = arith.addf %311, %312 : vector<16x32xf32>
    %cst_97 = arith.constant dense<0.000000e+00> : vector<16x128xf32>
    %314 = tpu.matmul %313, %192, %cst_97 {dimension_numbers = #tpu.dot_dimension_numbers<[1], [0], [0], [1], [0, 0, 1, 1], [], []>} : vector<16x32xf32>, vector<32x128xf32>, vector<16x128xf32> -> vector<16x128xf32>
    %315 = vector.broadcast %193 : vector<1x128xf32> to vector<16x128xf32>
    %316 = arith.addf %314, %315 : vector<16x128xf32>
    %cst_98 = arith.constant 5.000000e-01 : f32
    %317 = vector.broadcast %cst_98 : f32 to vector<16x128xf32>
    %318 = arith.mulf %317, %316 : vector<16x128xf32>
    %cst_99 = arith.constant 4.471500e-02 : f32
    %319 = vector.broadcast %cst_99 : f32 to vector<16x128xf32>
    %320 = arith.mulf %319, %316 : vector<16x128xf32>
    %321 = arith.mulf %320, %316 : vector<16x128xf32>
    %322 = arith.mulf %321, %316 : vector<16x128xf32>
    %323 = arith.addf %316, %322 : vector<16x128xf32>
    %cst_100 = arith.constant 0.797884583 : f32
    %324 = vector.broadcast %cst_100 : f32 to vector<16x128xf32>
    %325 = arith.mulf %324, %323 : vector<16x128xf32>
    %326 = math.tanh %325 : vector<16x128xf32>
    %cst_101 = arith.constant 1.000000e+00 : f32
    %327 = vector.broadcast %cst_101 : f32 to vector<16x128xf32>
    %328 = arith.addf %327, %326 : vector<16x128xf32>
    %329 = arith.mulf %318, %328 : vector<16x128xf32>
    %cst_102 = arith.constant dense<0.000000e+00> : vector<16x32xf32>
    %330 = tpu.matmul %329, %190, %cst_102 {dimension_numbers = #tpu.dot_dimension_numbers<[1], [0], [0], [1], [0, 0, 1, 1], [], []>} : vector<16x128xf32>, vector<128x32xf32>, vector<16x32xf32> -> vector<16x32xf32>
    %331 = vector.extract_strided_slice %191 {offsets = [8, 0], sizes = [1, 32], strides = [1, 1]} : vector<16x32xf32> to vector<1x32xf32>
    %332 = vector.broadcast %331 : vector<1x32xf32> to vector<16x32xf32>
    %333 = arith.addf %330, %332 : vector<16x32xf32>
    %334 = arith.addf %313, %333 : vector<16x32xf32>
    %335 = vector.extract_strided_slice %191 {offsets = [6, 0], sizes = [1, 32], strides = [1, 1]} : vector<16x32xf32> to vector<1x32xf32>
    %336 = vector.extract_strided_slice %191 {offsets = [7, 0], sizes = [1, 32], strides = [1, 1]} : vector<16x32xf32> to vector<1x32xf32>
    %cst_103 = arith.constant dense<0.000000e+00> : vector<16xf32>
    %337 = vector.multi_reduction <add>, %334, %cst_103 [1] : vector<16x32xf32> to vector<16xf32>
    %338 = vector.shape_cast %337 : vector<16xf32> to vector<16x1xf32>
    %cst_104 = arith.constant 3.200000e+01 : f32
    %339 = vector.broadcast %cst_104 : f32 to vector<16x1xf32>
    %340 = arith.divf %338, %339 : vector<16x1xf32>
    %341 = vector.broadcast %340 : vector<16x1xf32> to vector<16x32xf32>
    %342 = arith.subf %334, %341 : vector<16x32xf32>
    %343 = arith.mulf %342, %342 : vector<16x32xf32>
    %cst_105 = arith.constant dense<0.000000e+00> : vector<16xf32>
    %344 = vector.multi_reduction <add>, %343, %cst_105 [1] : vector<16x32xf32> to vector<16xf32>
    %345 = vector.shape_cast %344 : vector<16xf32> to vector<16x1xf32>
    %cst_106 = arith.constant 3.200000e+01 : f32
    %346 = vector.broadcast %cst_106 : f32 to vector<16x1xf32>
    %347 = arith.divf %345, %346 : vector<16x1xf32>
    %cst_107 = arith.constant 9.99999974E-6 : f32
    %348 = vector.broadcast %cst_107 : f32 to vector<16x1xf32>
    %349 = arith.addf %347, %348 : vector<16x1xf32>
    %350 = math.rsqrt %349 : vector<16x1xf32>
    %351 = vector.broadcast %350 : vector<16x1xf32> to vector<16x32xf32>
    %352 = arith.mulf %342, %351 : vector<16x32xf32>
    %353 = vector.broadcast %335 : vector<1x32xf32> to vector<16x32xf32>
    %354 = arith.mulf %352, %353 : vector<16x32xf32>
    %355 = vector.broadcast %336 : vector<1x32xf32> to vector<16x32xf32>
    %356 = arith.addf %354, %355 : vector<16x32xf32>
    %c144 = arith.constant 144 : index
    %c0_108 = arith.constant 0 : index
    %357 = vector.load %arg1[%c144, %c0_108] : memref<696x32xf32, #tpu.memory_space<vmem>>, vector<1x32xf32>
    %c145 = arith.constant 145 : index
    %c0_109 = arith.constant 0 : index
    %358 = vector.load %arg1[%c145, %c0_109] : memref<696x32xf32, #tpu.memory_space<vmem>>, vector<1x32xf32>
    %cst_110 = arith.constant dense<0.000000e+00> : vector<16xf32>
    %359 = vector.multi_reduction <add>, %356, %cst_110 [1] : vector<16x32xf32> to vector<16xf32>
    %360 = vector.shape_cast %359 : vector<16xf32> to vector<16x1xf32>
    %cst_111 = arith.constant 3.200000e+01 : f32
    %361 = vector.broadcast %cst_111 : f32 to vector<16x1xf32>
    %362 = arith.divf %360, %361 : vector<16x1xf32>
    %363 = vector.broadcast %362 : vector<16x1xf32> to vector<16x32xf32>
    %364 = arith.subf %356, %363 : vector<16x32xf32>
    %365 = arith.mulf %364, %364 : vector<16x32xf32>
    %cst_112 = arith.constant dense<0.000000e+00> : vector<16xf32>
    %366 = vector.multi_reduction <add>, %365, %cst_112 [1] : vector<16x32xf32> to vector<16xf32>
    %367 = vector.shape_cast %366 : vector<16xf32> to vector<16x1xf32>
    %cst_113 = arith.constant 3.200000e+01 : f32
    %368 = vector.broadcast %cst_113 : f32 to vector<16x1xf32>
    %369 = arith.divf %367, %368 : vector<16x1xf32>
    %cst_114 = arith.constant 9.99999974E-6 : f32
    %370 = vector.broadcast %cst_114 : f32 to vector<16x1xf32>
    %371 = arith.addf %369, %370 : vector<16x1xf32>
    %372 = math.rsqrt %371 : vector<16x1xf32>
    %373 = vector.broadcast %372 : vector<16x1xf32> to vector<16x32xf32>
    %374 = arith.mulf %364, %373 : vector<16x32xf32>
    %375 = vector.broadcast %357 : vector<1x32xf32> to vector<16x32xf32>
    %376 = arith.mulf %374, %375 : vector<16x32xf32>
    %377 = vector.broadcast %358 : vector<1x32xf32> to vector<16x32xf32>
    %378 = arith.addf %376, %377 : vector<16x32xf32>
    %c0_115 = arith.constant 0 : index
    %c0_116 = arith.constant 0 : index
    %379 = vector.load %arg2[%c0_115, %c0_116] : memref<112x128xf32, #tpu.memory_space<vmem>>, vector<32x128xf32>
    %cst_117 = arith.constant dense<0.000000e+00> : vector<16x128xf32>
    %380 = tpu.matmul %378, %379, %cst_117 {dimension_numbers = #tpu.dot_dimension_numbers<[1], [0], [0], [1], [0, 0, 1, 1], [], []>} : vector<16x32xf32>, vector<32x128xf32>, vector<16x128xf32> -> vector<16x128xf32>
    %c0_118 = arith.constant 0 : index
    %c0_119 = arith.constant 0 : index
    %381 = vector.load %arg3[%c0_118, %c0_119] : memref<16x128xf32, #tpu.memory_space<vmem>>, vector<16x128xf32>
    tpu.vector_store %arg3[%c0_118, %c0_119], %380 {strides = array<i32>} : memref<16x128xf32, #tpu.memory_space<vmem>>, vector<16x128xf32>,
    return
  }
}

</mosaic_0001>

<bundles_post_ra>
// kernel: transformer_forward.1
= control target key start
LH: loop header
LB: loop body
LE: loop exit
PB: predicated region body
PF: predicated region fallthrough
CT: control target
= control target key end

     0   :  { %v5620_v0 = vmov 0   ;;  %v16_v30 = vlaneseq  ;;  %v5621_v33 = vmov 1.0   ;;  %vm165_vm2 = vcmask 261120   ;;  %s5624_s20 = smov 120   ;;  %s5625_s21 = smov 112   ;;  %s6416_s0 = inlined_call_operand.vmem [shape: s32[16,1], index: 0, kind: input, shape index: {}]   ;;  %s6417_s1 = inlined_call_operand.vmem [shape: f32[696,32], index: 1, kind: input, shape index: {}]   ;;  %s6418_s2 = inlined_call_operand.vmem [shape: f32[112,128], index: 2, kind: input, shape index: {}]   ;;  %s6419_s3 = inlined_call_operand.vmem [shape: f32[16,128], index: 3, kind: output, shape index: {}]  }
   0x1   :  { %5527 = vset.pattern.permute.xlu0 %v5620_v0  ;;  %v14_v1 = vld [vmem:[%s6416_s0] sm:$0xff]  ;;  %v29_v3 = vld [vmem:[%s6417_s1 + $0x8] sm:$0xff]  ;;  %v30_v4 = vld [vmem:[%s6417_s1 + $0x10] sm:$0xff]  ;;  %v5622_v55 = vmov 0.0   ;;  %vm5623_vm3 = vmmov 0   ;;  %vm405_vm4 = vcmask 64512  }
   0x2   :  { %v28_v2 = vld [vmem:[%s6417_s1] sm:$0xff]  ;;  %19 = vperm.xlu0 %5527, %v14_v1   ;;  %v31_v5 = vld [vmem:[%s6417_s1 + $0x18] sm:$0xff]  ;;  %v15_v6 = vld [vmem:[%s6416_s0 + $0x8] sm:$0xff]  ;;  %v17_v31 = vand.u32 127, %v16_v30  ;;  %v5759_v56 = vshrl.u32 %v16_v30, 7  ;;  %s5626_s26 = smov 104  }
   0x3   :  { %v5340_v7 = vpack.c.bf16 %v29_v3, %v28_v2  ;;  %v5344_v8 = vpack.c.bf16 %v31_v5, %v30_v4  ;;  %v32_v9 = vld [vmem:[%s6417_s1 + $0x20] sm:$0xff]  ;;  %v33_v10 = vld [vmem:[%s6417_s1 + $0x28] sm:$0xff]  ;;  %v122_v12 = vld [vmem:[%s6417_s1 + $0x98] sm:$0xff] }
   0x4   :  { %v5348_v11 = vpack.c.bf16 %v33_v10, %v32_v9  ;;  %v123_v13 = vld [vmem:[%s6417_s1 + $0xa0] sm:$0xff]  ;;  %v34_v14 = vld [vmem:[%s6417_s1 + $0x30] sm:$0xff]  ;;  %v35_v15 = vld [vmem:[%s6417_s1 + $0x38] sm:$0xff]  ;;  %v249_v59 = vsub.s32 1, %v5759_v56  ;;  %v5768_v61 = vsub.s32 0, %v5759_v56  ;;  %v328_v2 = vsub.s32 2, %v5759_v56 }
   0x5   :  { %5341 = vmatprep.subr.bf16.mxu0 %v5340_v7  ;;  %v5372_v16 = vpack.c.bf16 %v123_v13, %v122_v12  ;;  %v5352_v17 = vpack.c.bf16 %v35_v15, %v34_v14  ;;  %v36_v18 = vld [vmem:[%s6417_s1 + $0x40] sm:$0xff]  ;;  %v37_v19 = vld [vmem:[%s6417_s1 + $0x48] sm:$0xff]  ;;  %v38_v21 = vld [vmem:[%s6417_s1 + $0x50] sm:$0xff] }
   0x6   :  { %22 = vperm.xlu0 %5527, %v15_v6   ;;  %5343 = vmatpush3.bf16.msra.mxu0 %v5340_v7  ;;  %v5356_v20 = vpack.c.bf16 %v37_v19, %v36_v18  ;;  %v39_v22 = vld [vmem:[%s6417_s1 + $0x58] sm:$0xff]  ;;  %v40_v24 = vld [vmem:[%s6417_s1 + $0x60] sm:$0xff]  ;;  %v41_v25 = vld [vmem:[%s6417_s1 + $0x68] sm:$0xff] }
   0x7   :  { %5345 = vmatprep.subr.bf16.mxu0 %v5344_v8  ;;  %5373 = vmatprep.subr.bf16.mxu1 %v5372_v16  ;;  %v5360_v23 = vpack.c.bf16 %v39_v22, %v38_v21  ;;  %v5364_v26 = vpack.c.bf16 %v41_v25, %v40_v24  ;;  %v42_v27 = vld [vmem:[%s6417_s1 + $0x70] sm:$0xff]  ;;  %v43_v28 = vld [vmem:[%s6417_s1 + $0x78] sm:$0xff]  ;;  %v124_v35 = vld [vmem:[%s6417_s1 + $0xa8] sm:$0xff] }
   0x8   :  { %5375 = vmatpush3.bf16.msra.mxu1 %v5372_v16  ;;  %v5368_v29 = vpack.c.bf16 %v43_v28, %v42_v27  ;;  %v125_v36 = vld [vmem:[%s6417_s1 + $0xb0] sm:$0xff]  ;;  %v126_v38 = vld [vmem:[%s6417_s1 + $0xb8] sm:$0xff]  ;;  %v127_v39 = vld [vmem:[%s6417_s1 + $0xc0] sm:$0xff] }
   0x9   :  { %v5376_v37 = vpack.c.bf16 %v125_v36, %v124_v35  ;;  %v5380_v40 = vpack.c.bf16 %v127_v39, %v126_v38  ;;  %v44_v41 = vld [vmem:[%s6417_s1 + $0x80] sm:$0xff]  ;;  %v128_v43 = vld [vmem:[%s6417_s1 + $0xc8] sm:$0xff]  ;;  %v129_v44 = vld [vmem:[%s6417_s1 + $0xd0] sm:$0xff] }
   0xa   :  { %5347 = vmatpush3.bf16.msra.mxu0 %v5344_v8  ;;  %v5384_v48 = vpack.c.bf16 %v129_v44, %v128_v43  ;;  %v130_v49 = vld [vmem:[%s6417_s1 + $0xd8] sm:$0xff]  ;;  %v131_v50 = vld [vmem:[%s6417_s1 + $0xe0] sm:$0xff]  ;;  %v132_v52 = vld [vmem:[%s6417_s1 + $0xe8] sm:$0xff] }
   0xb   :  { %5349 = vmatprep.subr.bf16.mxu0 %v5348_v11  ;;  %5377 = vmatprep.subr.bf16.mxu1 %v5376_v37  ;;  %v5388_v51 = vpack.c.bf16 %v131_v50, %v130_v49  ;;  %v133_v53 = vld [vmem:[%s6417_s1 + $0xf0] sm:$0xff]  ;;  %v5765_v60 = vld [vmem:[%s6417_s1 + $0x198] sm:$0xff] }
   0xc   :  { %5379 = vmatpush3.bf16.msra.mxu1 %v5376_v37  ;;  %v5392_v54 = vpack.c.bf16 %v133_v53, %v132_v52  ;;  %v250_v62 = vrot.slane %v5765_v60, %v249_v59  ;;  %v164_v0 = vrot.slane %v5765_v60, %v5768_v61  ;;  %v329_v5 = vrot.slane %v5765_v60, %v328_v2 }
   0xd   :  { %5381 = vmatprep.subr.bf16.mxu1 %v5380_v40 }
   0xe   :  { %5351 = vmatpush3.bf16.msra.mxu0 %v5348_v11 }
   0xf   :  { %5353 = vmatprep.subr.bf16.mxu0 %v5352_v17 }
  0x12   :  { %5355 = vmatpush3.bf16.msra.mxu0 %v5352_v17 }
  0x13   :  { %5357 = vmatprep.subr.bf16.mxu0 %v5356_v20 }
  0x16   :  { %5359 = vmatpush3.bf16.msra.mxu0 %v5356_v20 }
  0x17   :  { %5361 = vmatprep.subr.bf16.mxu0 %v5360_v23 }
  0x1a   :  { %5363 = vmatpush3.bf16.msra.mxu0 %v5360_v23 }
  0x1b   :  { %5365 = vmatprep.subr.bf16.mxu0 %v5364_v26 }
  0x1e   :  { %5367 = vmatpush3.bf16.msra.mxu0 %v5364_v26 }
  0x1f   :  { %5369 = vmatprep.subr.bf16.mxu0 %v5368_v29 }
  0x22   :  { %5371 = vmatpush3.bf16.msra.mxu0 %v5368_v29 }
  0x81   :  { %v20_v32 = vpop.permute.xlu0 %19 }
  0x82   :  { %vm24_vm0 = vcmp.eq.s32.totalorder %v20_v32, %v17_v31 }
  0x83   :  { %4968 = vmatprep.mubr.msk.f32.mxu0 %vm24_vm0, %v5621_v33 }
  0x85   :  { %v23_v34 = vpop.permute.xlu0 %22 }
  0x86   :  { %vm25_vm1 = vcmp.eq.s32.totalorder %v23_v34, %v17_v31 }
  0x87   :  { %4969 = vmatmul.mubr.msk.f32.vlgmr.msra.gmra.mrb[0].mxu0 %vm25_vm1, %v5621_v33 }
 0x15a   :  { %v4970_v42 = vpop.f32.mrb[0].mxu0 }
 0x15b   :  { %v111_v45 = vpop.f32.mrb[1].mxu0  ;;  %v5730_v47 = vadd.f32 %v4970_v42, %v44_v41 }
 0x15c   :  { %v5728_v46 = vadd.f32 %v111_v45, %v44_v41 }
 0x15e   :  { %4979 = vmatprep.mubr.msk.f32.mxu1 %vm165_vm2, %v5728_v46 }
 0x15f   :  { %4980 = vmatmul.mubr.msk.f32.vlgmr.msra.gmra.mrb[0].mxu1 %vm165_vm2, %v5730_v47 }
 0x160   :  { %5383 = vmatpush3.bf16.msra.mxu1 %v5380_v40  ;;  %4990 = vmatprep.mubr.msk.f32.mxu1 %vm165_vm2, %v5728_v46 }
 0x161   :  { %5385 = vmatprep.subr.bf16.mxu1 %v5384_v48 }
 0x164   :  { %5387 = vmatpush3.bf16.msra.mxu1 %v5384_v48 }
 0x165   :  { %5389 = vmatprep.subr.bf16.mxu1 %v5388_v51 }
 0x167   :  { %4991 = vmatmul.mubr.msk.f32.vlgmr.msra.gmra.mrb[2].mxu1 %vm165_vm2, %v5730_v47 }
 0x168   :  { %5391 = vmatpush3.bf16.msra.mxu1 %v5388_v51  ;;  %5001 = vmatprep.mubr.msk.f32.mxu1 %vm165_vm2, %v5728_v46 }
 0x169   :  { %5393 = vmatprep.subr.bf16.mxu1 %v5392_v54 }
 0x16c   :  { %5395 = vmatpush3.bf16.msra.mxu1 %v5392_v54 }
 0x16d   :  { %5004 = vmatprep.subr.mxu1 %v5622_v55 }
 0x16f   :  { %5002 = vmatmul.mubr.msk.f32.vlgmr.msra.gmra.mrb[4].mxu1 %vm165_vm2, %v5730_v47 }
 0x170   :  { %5006 = vmatprep.mubr.msk.f32.mxu1 %vm5623_vm3, %v5622_v55 }
 0x232   :  { %v4981_v57 = vpop.f32.mrb[0].mxu1 }
 0x233   :  { %v238_v58 = vpop.f32.mrb[1].mxu1  ;;  %v5794_v8 = vadd.f32 %v4981_v57, %v164_v0 }
 0x234   :  { %v5780_v4 = vadd.f32 %v238_v58, %v164_v0 }
 0x23a   :  { %v4992_v63 = vpop.f32.mrb[2].mxu1 }
 0x23b   :  { %v317_v1 = vpop.f32.mrb[3].mxu1  ;;  %v5786_v6 = vadd.f32 %v4992_v63, %v250_v62 }
 0x23c   :  { %v5776_v3 = vadd.f32 %v317_v1, %v250_v62 }
 0x23e   :  { %5005 = vmatpush3.xpose.msk.msra.mxu1 %vm405_vm4, %v5776_v3 }
 0x23f   :  { %5009 = vmatprep.subr.mxu1 %v5622_v55 }
 0x241   :  { %5007 = vmatmul.mubr.msk.f32.vlgmr.msra.gmra.mrb[6].mxu1 %vm405_vm4, %v5780_v4 }
 0x242   :  { %v5003_v7 = vpop.f32.mrb[4].mxu1  ;;  %5010 = vmatpush3.xpose.msk.msra.mxu1 %vm405_vm4, %v5786_v6  ;;  %5011 = vmatprep.mubr.msk.f32.mxu1 %vm5623_vm3, %v5622_v55 }
 0x243   :  { %v5796_v9 = vadd.f32 %v5003_v7, %v329_v5  ;;  %v396_v10 = vpop.f32.mrb[5].mxu1  ;;  %5014 = vmatprep.subr.mxu1 %v5622_v55 }
 0x244   :  { %v5799_v11 = vadd.f32 %v396_v10, %v329_v5 }
 0x245   :  { %5012 = vmatmul.mubr.msk.f32.vlgmr.msra.gmra.mrb[8].mxu1 %vm405_vm4, %v5794_v8 }
 0x246   :  { %5015 = vmatpush3.msra.mxu1 %v5799_v11  ;;  %5016 = vmatprep.mubr.msk.f32.mxu1 %vm5623_vm3, %v5622_v55 }
 0x247   :  { %5019 = vmatprep.subr.mxu1 %v5622_v55 }
 0x314   :  { %v478_v12 = vpop.f32.mrb[6].mxu1 }
 0x315   :  { %v5008_v13 = vpop.f32.mrb[7].mxu1  ;;  %v558_v14 = vsel %vm405_vm4, %v478_v12, -inf }
 0x316   :  { %559 = vmax.xlane.f32.xlu1 %v558_v14 }
 0x318   :  { %v554_v15 = vpop.f32.mrb[8].mxu1 }
 0x319   :  { %v5013_v16 = vpop.f32.mrb[9].mxu1  ;;  %v561_v17 = vsel %vm405_vm4, %v554_v15, -inf }
 0x31a   :  { %562 = vmax.xlane.f32.xlu1 %v561_v17 }
 0x32b   :  { %730 = vrot.lane.b32.xlu1 %v5776_v3, %s5624_s20 }
 0x32f   :  { %728 = vrot.lane.b32.xlu1 %v5780_v4, %s5624_s20 }
 0x3a3   :  { %v560_v18 = vpop.xlane.xlu1 %559 }
 0x3a4   :  { %v564_v19 = vsub.f32 %v478_v12, %v560_v18 }
 0x3a6   :  { %v566_v20 = vmul.f32 1.442695, %v564_v19 }
 0x3a7   :  { %v563_v21 = vpop.xlane.xlu1 %562 }
 0x3a8   :  { %5528 = vpow2.f32 %v566_v20  ;;  %v565_v22 = vsub.f32 %v554_v15, %v563_v21  ;;  %v135_v20 = vld [vmem:[%s6417_s1 + $0x100] sm:$0xff]  ;;  %v134_v21 = vld [vmem:[%s6417_s1 + $0xf8] sm:$0xff] }
 0x3a9   :  { %5044 = vmatprep.subr.mxu0 %v135_v20 }
 0x3aa   :  { %v568_v23 = vmul.f32 1.442695, %v565_v22  ;;  %5045 = vmatpush3.msra.mxu0 %v135_v20 }
 0x3ab   :  { %v731_v28 = vpop.permute.xlu1 %730  ;;  %5049 = vmatprep.subr.mxu0 %v134_v21 }
 0x3ac   :  { %5530 = vpow2.f32 %v568_v23 }
 0x3af   :  { %v729_v29 = vpop.permute.xlu1 %728 }
 0x3b2   :  { %v5529_v24 = vpop.eup %5528 }
 0x3b3   :  { %v570_v25 = vsel %vm405_vm4, %v5529_v24, 0.0 }
 0x3b4   :  { %571 = vadd.xlane.f32.xlu0 %v570_v25 }
 0x3b6   :  { %v5531_v26 = vpop.eup %5530 }
 0x3b7   :  { %v573_v27 = vsel %vm405_vm4, %v5531_v26, 0.0 }
 0x3b8   :  { %574 = vadd.xlane.f32.xlu1 %v573_v27 }
 0x3c9   :  { %808 = vrot.lane.b32.xlu1 %v5786_v6, %s5624_s20 }
 0x3cd   :  { %806 = vrot.lane.b32.xlu1 %v5794_v8, %s5624_s20 }
 0x441   :  { %v572_v30 = vpop.xlane.xlu0 %571 }
 0x442   :  { %5532 = vrcp.f32 %v572_v30 }
 0x445   :  { %v575_v31 = vpop.xlane.xlu1 %574 }
 0x446   :  { %5534 = vrcp.f32 %v575_v31 }
 0x449   :  { %v809_v36 = vpop.permute.xlu1 %808 }
 0x44c   :  { %v5533_v32 = vpop.eup %5532 }
 0x44d   :  { %v580_v33 = vmul.f32 %v5533_v32, %v5529_v24  ;;  %v807_v37 = vpop.permute.xlu1 %806 }
 0x44f   :  { %5017 = vmatmul.mubr.msk.f32.vlgmr.msra.gmra.mrb[10].mxu1 %vm405_vm4, %v580_v33 }
 0x450   :  { %v5535_v34 = vpop.eup %5534  ;;  %5020 = vmatpush3.msra.mxu1 %v5796_v9  ;;  %5021 = vmatprep.mubr.msk.f32.mxu1 %vm5623_vm3, %v5622_v55 }
 0x451   :  { %v581_v35 = vmul.f32 %v5535_v34, %v5531_v26  ;;  %5024 = vmatprep.subr.mxu1 %v5622_v55 }
 0x453   :  { %5022 = vmatmul.mubr.msk.f32.vlgmr.msra.gmra.mrb[12].mxu1 %vm405_vm4, %v581_v35 }
 0x454   :  { %5026 = vmatprep.mubr.msk.f32.mxu1 %vm5623_vm3, %v5622_v55 }
 0x457   :  { %5025 = vmatpush3.xpose.msk.msra.mxu1 %vm405_vm4, %v731_v28 }
 0x458   :  { %5029 = vmatprep.subr.mxu1 %v5622_v55 }
 0x45a   :  { %5027 = vmatmul.mubr.msk.f32.vlgmr.msra.gmra.mrb[14].mxu1 %vm405_vm4, %v729_v29 }
 0x45b   :  { %5030 = vmatpush3.xpose.msk.msra.mxu1 %vm405_vm4, %v809_v36  ;;  %5031 = vmatprep.mubr.msk.f32.mxu1 %vm5623_vm3, %v5622_v55 }
 0x45c   :  { %5034 = vmatprep.subr.mxu1 %v5622_v55 }
 0x45e   :  { %5032 = vmatmul.mubr.msk.f32.vlgmr.msra.gmra.mrb[16].mxu1 %vm405_vm4, %v807_v37 }
 0x45f   :  { %5036 = vmatprep.mubr.msk.f32.mxu1 %vm5623_vm3, %v5622_v55 }
 0x522   :  { %v5837_v38 = vpop.f32.mrb[10].mxu1 }
 0x523   :  { %v5018_v39 = vpop.f32.mrb[11].mxu1 }
 0x526   :  { %v5839_v40 = vpop.f32.mrb[12].mxu1 }
 0x527   :  { %v5023_v41 = vpop.f32.mrb[13].mxu1 }
 0x52d   :  { %v802_v42 = vpop.f32.mrb[14].mxu1 }
 0x52e   :  { %v5028_v43 = vpop.f32.mrb[15].mxu1  ;;  %v884_v44 = vsel %vm405_vm4, %v802_v42, -inf }
 0x52f   :  { %885 = vmax.xlane.f32.xlu0 %v884_v44  ;;  %v136_v43 = vld [vmem:[%s6417_s1 + $0x108] sm:$0xff] }
 0x531   :  { %v880_v45 = vpop.f32.mrb[16].mxu1 }
 0x532   :  { %v5033_v48 = vpop.f32.mrb[17].mxu1  ;;  %v887_v49 = vsel %vm405_vm4, %v880_v45, -inf }
 0x533   :  { %888 = vmax.xlane.f32.xlu1 %v887_v49 }
 0x544   :  { %1224 = vrot.lane.b32.xlu1 %v5780_v4, %s5625_s21 }
 0x545   :  { %909 = vrot.lane.b32.xlu0 %v5799_v11, %s5624_s20 }
 0x549   :  { %986 = vrot.lane.b32.xlu0 %v5796_v9, %s5624_s20 }
 0x5bc   :  { %v886_v50 = vpop.xlane.xlu0 %885 }
 0x5bd   :  { %v890_v51 = vsub.f32 %v802_v42, %v886_v50 }
 0x5bf   :  { %v892_v52 = vmul.f32 1.442695, %v890_v51 }
 0x5c0   :  { %v910_v53 = vpop.permute.xlu0 %909  ;;  %v889_v58 = vpop.xlane.xlu1 %888 }
 0x5c1   :  { %5536 = vpow2.f32 %v892_v52  ;;  %5035 = vmatpush3.msra.mxu1 %v910_v53  ;;  %v891_v62 = vsub.f32 %v880_v45, %v889_v58 }
 0x5c2   :  { %5039 = vmatprep.subr.mxu1 %v5622_v55 }
 0x5c3   :  { %v894_v63 = vmul.f32 1.442695, %v891_v62 }
 0x5c4   :  { %v987_v5 = vpop.permute.xlu0 %986  ;;  %v1225_v18 = vpop.permute.xlu1 %1224 }
 0x5c5   :  { %5538 = vpow2.f32 %v894_v63 }
 0x5cb   :  { %v5537_v54 = vpop.eup %5536 }
 0x5cc   :  { %v896_v57 = vsel %vm405_vm4, %v5537_v54, 0.0 }
 0x5cd   :  { %897 = vadd.xlane.f32.xlu0 %v896_v57 }
 0x5cf   :  { %v5539_v0 = vpop.eup %5538 }
 0x5d0   :  { %v899_v1 = vsel %vm405_vm4, %v5539_v0, 0.0 }
 0x5e3   :  { %1226 = vrot.lane.b32.xlu0 %v5776_v3, %s5625_s21 }
 0x602   :  { %900 = vadd.xlane.f32.xlu0 %v899_v1 }
 0x618   :  { %1304 = vrot.lane.b32.xlu0 %v5786_v6, %s5625_s21 }
 0x61c   :  { %1302 = vrot.lane.b32.xlu0 %v5794_v8, %s5625_s21 }
 0x65a   :  { %v898_v7 = vpop.xlane.xlu0 %897 }
 0x65b   :  { %5540 = vrcp.f32 %v898_v7 }
 0x65e   :  { %v1227_v13 = vpop.permute.xlu0 %1226 }
 0x665   :  { %v5541_v10 = vpop.eup %5540 }
 0x666   :  { %v906_v12 = vmul.f32 %v5541_v10, %v5537_v54 }
 0x668   :  { %5037 = vmatmul.mubr.msk.f32.vlgmr.msra.gmra.mrb[18].mxu1 %vm405_vm4, %v906_v12 }
 0x669   :  { %5040 = vmatpush3.msra.mxu1 %v987_v5  ;;  %5041 = vmatprep.mubr.msk.f32.mxu1 %vm5623_vm3, %v5622_v55 }
 0x66a   :  { %5054 = vmatprep.subr.mxu1 %v5622_v55 }
 0x68f   :  { %v901_v14 = vpop.xlane.xlu0 %900 }
 0x690   :  { %5542 = vrcp.f32 %v901_v14 }
 0x693   :  { %v1305_v17 = vpop.permute.xlu0 %1304 }
 0x697   :  { %v1303_v19 = vpop.permute.xlu0 %1302 }
 0x69a   :  { %v5543_v15 = vpop.eup %5542 }
 0x69b   :  { %v907_v16 = vmul.f32 %v5543_v15, %v5539_v0 }
 0x69d   :  { %5042 = vmatmul.mubr.msk.f32.vlgmr.msra.gmra.mrb[20].mxu1 %vm405_vm4, %v907_v16 }
 0x69e   :  { %5055 = vmatpush3.xpose.msk.msra.mxu1 %vm405_vm4, %v1227_v13  ;;  %5056 = vmatprep.mubr.msk.f32.mxu1 %vm5623_vm3, %v5622_v55 }
 0x69f   :  { %5059 = vmatprep.subr.mxu1 %v5622_v55 }
 0x6a1   :  { %5057 = vmatmul.mubr.msk.f32.vlgmr.msra.gmra.mrb[22].mxu1 %vm405_vm4, %v1225_v18 }
 0x6a2   :  { %5060 = vmatpush3.xpose.msk.msra.mxu1 %vm405_vm4, %v1305_v17  ;;  %5061 = vmatprep.mubr.msk.f32.mxu1 %vm5623_vm3, %v5622_v55 }
 0x6a3   :  { %5069 = vmatprep.subr.mxu1 %v5622_v55 }
 0x6a5   :  { %5062 = vmatmul.mubr.msk.f32.vlgmr.msra.gmra.mrb[24].mxu1 %vm405_vm4, %v1303_v19 }
 0x6a6   :  { %5071 = vmatprep.mubr.msk.f32.mxu1 %vm5623_vm3, %v5622_v55 }
 0x73b   :  { %v981_v22 = vpop.f32.mrb[18].mxu1 }
 0x73c   :  { %v5038_v23 = vpop.f32.mrb[19].mxu1  ;;  %5046 = vmatprep.mubr.msk.f32.mxu0 %vm405_vm4, %v981_v22 }
 0x770   :  { %v1058_v24 = vpop.f32.mrb[20].mxu1 }
 0x771   :  { %v5043_v25 = vpop.f32.mrb[21].mxu1  ;;  %5047 = vmatmul.mubr.msk.f32.vlgmr.msra.gmra.mrb[2].mxu0 %vm405_vm4, %v1058_v24 }
 0x772   :  { %5051 = vmatprep.mubr.msk.f32.mxu0 %vm405_vm4, %v5837_v38  ;;  %5050 = vmatpush3.msra.mxu0 %v134_v21  ;;  %v137_v25 = vld [vmem:[%s6417_s1 + $0x110] sm:$0xff] }
 0x773   :  { %5064 = vmatprep.subr.mxu0 %v5622_v55 }
 0x774   :  { %v1298_v26 = vpop.f32.mrb[22].mxu1 }
 0x775   :  { %v5058_v27 = vpop.f32.mrb[23].mxu1  ;;  %v1380_v28 = vsel %vm405_vm4, %v1298_v26, -inf }
 0x776   :  { %1381 = vmax.xlane.f32.xlu0 %v1380_v28 }
 0x778   :  { %v1376_v29 = vpop.f32.mrb[24].mxu1 }
 0x779   :  { %5052 = vmatmul.mubr.msk.f32.vlgmr.msra.gmra.mrb[2].mxu0 %vm405_vm4, %v5839_v40  ;;  %v5063_v30 = vpop.f32.mrb[25].mxu1  ;;  %v1383_v31 = vsel %vm405_vm4, %v1376_v29, -inf }
 0x77a   :  { %1384 = vmax.xlane.f32.xlu1 %v1383_v31  ;;  %5066 = vmatprep.mubr.msk.f32.mxu0 %vm5623_vm3, %v5622_v55 }
 0x78b   :  { %1480 = vrot.lane.b32.xlu1 %v5796_v9, %s5625_s21 }
 0x78f   :  { %1641 = vrot.lane.b32.xlu1 %v5776_v3, %s5626_s26 }
 0x793   :  { %1639 = vrot.lane.b32.xlu1 %v5780_v4, %s5626_s26 }
 0x803   :  { %v1382_v32 = vpop.xlane.xlu0 %1381 }
 0x804   :  { %v1386_v33 = vsub.f32 %v1298_v26, %v1382_v32  ;;  %v2056_v32 = vsub.s32 3, %v5759_v56 }
 0x806   :  { %v1388_v34 = vmul.f32 1.442695, %v1386_v33  ;;  %v2057_v33 = vrot.slane %v5765_v60, %v2056_v32 }
 0x807   :  { %v1385_v35 = vpop.xlane.xlu1 %1384 }
 0x808   :  { %5544 = vpow2.f32 %v1388_v34  ;;  %v1387_v36 = vsub.f32 %v1376_v29, %v1385_v35 }
 0x80a   :  { %v1390_v37 = vmul.f32 1.442695, %v1387_v36 }
 0x80b   :  { %v1481_v38 = vpop.permute.xlu1 %1480 }
 0x80c   :  { %5546 = vpow2.f32 %v1390_v37  ;;  %5070 = vmatpush3.msra.mxu1 %v1481_v38 }
 0x80d   :  { %5079 = vmatprep.subr.mxu1 %v5622_v55 }
 0x812   :  { %v5545_v39 = vpop.eup %5544 }
 0x813   :  { %v1392_v40 = vsel %vm405_vm4, %v5545_v39, 0.0 }
 0x814   :  { %1393 = vadd.xlane.f32.xlu0 %v1392_v40 }
 0x816   :  { %v5547_v3 = vpop.eup %5546 }
 0x817   :  { %v1395_v41 = vsel %vm405_vm4, %v5547_v3, 0.0 }
 0x818   :  { %1396 = vadd.xlane.f32.xlu0 %v1395_v41 }
 0x82e   :  { %1404 = vrot.lane.b32.xlu0 %v5799_v11, %s5625_s21 }
 0x832   :  { %1719 = vrot.lane.b32.xlu0 %v5786_v6, %s5626_s26  ;;  %v1642_v6 = vpop.permute.xlu1 %1641 }
 0x836   :  { %1717 = vrot.lane.b32.xlu0 %v5794_v8, %s5626_s26  ;;  %v1640_v8 = vpop.permute.xlu1 %1639 }
 0x8a1   :  { %v1394_v4 = vpop.xlane.xlu0 %1393 }
 0x8a2   :  { %5548 = vrcp.f32 %v1394_v4 }
 0x8a5   :  { %v1397_v42 = vpop.xlane.xlu0 %1396 }
 0x8a6   :  { %5550 = vrcp.f32 %v1397_v42 }
 0x8a9   :  { %v1405_v44 = vpop.permute.xlu0 %1404 }
 0x8aa   :  { %5065 = vmatpush3.msra.mxu0 %v1405_v44 }
 0x8ab   :  { %5074 = vmatprep.subr.mxu0 %v136_v43 }
 0x8ac   :  { %v5549_v45 = vpop.eup %5548 }
 0x8ad   :  { %v1402_v48 = vmul.f32 %v5549_v45, %v5545_v39  ;;  %v1720_v53 = vpop.permute.xlu0 %1719 }
 0x8af   :  { %5067 = vmatmul.mubr.msk.f32.vlgmr.msra.gmra.mrb[4].mxu0 %vm405_vm4, %v1402_v48 }
 0x8b0   :  { %v5551_v49 = vpop.eup %5550  ;;  %5075 = vmatpush3.msra.mxu0 %v136_v43 }
 0x8b1   :  { %v1403_v50 = vmul.f32 %v5551_v49, %v5547_v3  ;;  %5084 = vmatprep.subr.mxu0 %v5622_v55  ;;  %v1718_v58 = vpop.permute.xlu0 %1717 }
 0x8b3   :  { %5072 = vmatmul.mubr.msk.f32.vlgmr.msra.gmra.mrb[26].mxu1 %vm405_vm4, %v1403_v50  ;;  %v157_v50 = vld [vmem:[%s6418_s2 + $0x28] sm:$0xff] }
 0x8b4   :  { %5080 = vmatpush3.xpose.msk.msra.mxu1 %vm405_vm4, %v1642_v6  ;;  %5081 = vmatprep.mubr.msk.f32.mxu1 %vm5623_vm3, %v5622_v55 }
 0x8b5   :  { %5089 = vmatprep.subr.mxu1 %v5622_v55 }
 0x8b7   :  { %5082 = vmatmul.mubr.msk.f32.vlgmr.msra.gmra.mrb[28].mxu1 %vm405_vm4, %v1640_v8 }
 0x8b8   :  { %5091 = vmatprep.mubr.msk.f32.mxu1 %vm5623_vm3, %v5622_v55 }
 0x982   :  { %v1476_v51 = vpop.f32.mrb[4].mxu0 }
 0x983   :  { %v5068_v52 = vpop.f32.mrb[5].mxu0  ;;  %5076 = vmatprep.mubr.msk.f32.mxu0 %vm405_vm4, %v1476_v51  ;;  %v158_v51 = vld [vmem:[%s6418_s2 + $0x30] sm:$0xff] }
 0x984   :  { %v159_v52 = vld [vmem:[%s6418_s2 + $0x38] sm:$0xff] }
 0x986   :  { %v1552_v54 = vpop.f32.mrb[26].mxu1 }
 0x987   :  { %v5073_v57 = vpop.f32.mrb[27].mxu1  ;;  %5077 = vmatmul.mubr.msk.f32.vlgmr.msra.gmra.mrb[2].mxu0 %vm405_vm4, %v1552_v54  ;;  %v138_v54 = vld [vmem:[%s6417_s1 + $0x118] sm:$0xff] }
 0x988   :  { %5085 = vmatpush3.xpose.msk.msra.mxu0 %vm405_vm4, %v1720_v53  ;;  %5086 = vmatprep.mubr.msk.f32.mxu0 %vm5623_vm3, %v5622_v55  ;;  %v5400_v53 = vpack.c.bf16 %v159_v52, %v158_v51  ;;  %v139_v57 = vld [vmem:[%s6417_s1 + $0x120] sm:$0xff] }
 0x989   :  { %5094 = vmatprep.subr.mxu0 %v5622_v55 }
 0x98a   :  { %v1713_v62 = vpop.f32.mrb[28].mxu1 }
 0x98b   :  { %v5083_v63 = vpop.f32.mrb[29].mxu1  ;;  %5087 = vmatmul.mubr.msk.f32.vlgmr.msra.gmra.mrb[6].mxu0 %vm405_vm4, %v1718_v58  ;;  %v1795_v0 = vsel %vm405_vm4, %v1713_v62, -inf  ;;  %v5404_v58 = vpack.c.bf16 %v139_v57, %v138_v54 }
 0x98c   :  { %1796 = vmax.xlane.f32.xlu1 %v1795_v0  ;;  %5096 = vmatprep.mubr.msk.f32.mxu0 %vm5623_vm3, %v5622_v55 }
 0xa19   :  { %v1797_v1 = vpop.xlane.xlu1 %1796 }
 0xa1a   :  { %v1801_v5 = vsub.f32 %v1713_v62, %v1797_v1 }
 0xa1c   :  { %v1803_v7 = vmul.f32 1.442695, %v1801_v5 }
 0xa1e   :  { %5552 = vpow2.f32 %v1803_v7 }
 0xa28   :  { %v5553_v14 = vpop.eup %5552 }
 0xa29   :  { %v1807_v15 = vsel %vm405_vm4, %v5553_v14, 0.0 }
 0xa5e   :  { %v1791_v10 = vpop.f32.mrb[6].mxu0 }
 0xa5f   :  { %v5088_v12 = vpop.f32.mrb[7].mxu0  ;;  %v1798_v13 = vsel %vm405_vm4, %v1791_v10, -inf }
 0xa60   :  { %1799 = vmax.xlane.f32.xlu0 %v1798_v13  ;;  %v2097_v12 = vsub.s32 5, %v5759_v56 }
 0xa64   :  { %1808 = vadd.xlane.f32.xlu0 %v1807_v15 }
 0xa7a   :  { %1819 = vrot.lane.b32.xlu0 %v5799_v11, %s5626_s26 }
 0xaed   :  { %v1800_v16 = vpop.xlane.xlu0 %1799 }
 0xaee   :  { %v1802_v17 = vsub.f32 %v1791_v10, %v1800_v16  ;;  %v2091_v10 = vsub.s32 4, %v5759_v56 }
 0xaf0   :  { %v1805_v18 = vmul.f32 1.442695, %v1802_v17  ;;  %v2092_v13 = vrot.slane %v5765_v60, %v2091_v10 }
 0xaf1   :  { %v1809_v19 = vpop.xlane.xlu0 %1808 }
 0xaf2   :  { %5554 = vpow2.f32 %v1805_v18  ;;  %v2098_v18 = vrot.slane %v5765_v60, %v2097_v12 }
 0xaf3   :  { %5556 = vrcp.f32 %v1809_v19 }
 0xaf5   :  { %v1820_v20 = vpop.permute.xlu0 %1819 }
 0xaf6   :  { %5090 = vmatpush3.msra.mxu1 %v1820_v20 }
 0xafc   :  { %v5555_v21 = vpop.eup %5554 }
 0xafd   :  { %v5557_v22 = vpop.eup %5556  ;;  %v1810_v23 = vsel %vm405_vm4, %v5555_v21, 0.0 }
 0xafe   :  { %v1817_v24 = vmul.f32 %v5557_v22, %v5553_v14  ;;  %1811 = vadd.xlane.f32.xlu1 %v1810_v23  ;;  %v140_v23 = vld [vmem:[%s6417_s1 + $0x128] sm:$0xff] }
 0xb00   :  { %5092 = vmatmul.mubr.msk.f32.vlgmr.msra.gmra.mrb[30].mxu1 %vm405_vm4, %v1817_v24  ;;  %v141_v24 = vld [vmem:[%s6417_s1 + $0x130] sm:$0xff] }
 0xb0f   :  { %1895 = vrot.lane.b32.xlu1 %v5796_v9, %s5626_s26 }
 0xb8b   :  { %v1812_v11 = vpop.xlane.xlu1 %1811 }
 0xb8c   :  { %5558 = vrcp.f32 %v1812_v11  ;;  %v5408_v11 = vpack.c.bf16 %v141_v24, %v140_v23 }
 0xb8f   :  { %v1896_v26 = vpop.permute.xlu1 %1895 }
 0xb90   :  { %5095 = vmatpush3.msra.mxu0 %v1896_v26  ;;  %v143_v26 = vld [vmem:[%s6417_s1 + $0x140] sm:$0xff] }
 0xb91   :  { %5099 = vmatprep.subr.mxu0 %v137_v25 }
 0xb96   :  { %v5559_v27 = vpop.eup %5558 }
 0xb97   :  { %v1818_v28 = vmul.f32 %v5559_v27, %v5555_v21 }
 0xb99   :  { %5097 = vmatmul.mubr.msk.f32.vlgmr.msra.gmra.mrb[8].mxu0 %vm405_vm4, %v1818_v28  ;;  %v144_v28 = vld [vmem:[%s6417_s1 + $0x148] sm:$0xff] }
 0xb9a   :  { %5100 = vmatpush3.msra.mxu0 %v137_v25  ;;  %v142_v25 = vld [vmem:[%s6417_s1 + $0x138] sm:$0xff] }
 0xb9b   :  { %5405 = vmatprep.subr.bf16.mxu0 %v5404_v58  ;;  %v5412_v27 = vpack.c.bf16 %v143_v26, %v142_v25 }
 0xbd3   :  { %v1891_v29 = vpop.f32.mrb[30].mxu1 }
 0xbd4   :  { %v5093_v30 = vpop.f32.mrb[31].mxu1  ;;  %5101 = vmatprep.mubr.msk.f32.mxu0 %vm405_vm4, %v1891_v29  ;;  %v145_v29 = vld [vmem:[%s6417_s1 + $0x150] sm:$0xff] }
 0xbd5   :  { %v5416_v30 = vpack.c.bf16 %v145_v29, %v144_v28 }
 0xc6c   :  { %v1967_v31 = vpop.f32.mrb[8].mxu0 }
 0xc6d   :  { %v5098_v9 = vpop.f32.mrb[9].mxu0  ;;  %5102 = vmatmul.mubr.msk.f32.vlgmr.msra.gmra.mrb[2].mxu0 %vm405_vm4, %v1967_v31  ;;  %v146_v31 = vld [vmem:[%s6417_s1 + $0x158] sm:$0xff] }
 0xc6e   :  { %5407 = vmatpush3.bf16.msra.mxu0 %v5404_v58  ;;  %v147_v9 = vld [vmem:[%s6417_s1 + $0x160] sm:$0xff] }
 0xc6f   :  { %5409 = vmatprep.subr.bf16.mxu0 %v5408_v11 }
 0xc72   :  { %5411 = vmatpush3.bf16.msra.mxu0 %v5408_v11 }
 0xc73   :  { %5413 = vmatprep.subr.bf16.mxu0 %v5412_v27 }
 0xc76   :  { %5415 = vmatpush3.bf16.msra.mxu0 %v5412_v27 }
 0xc77   :  { %5417 = vmatprep.subr.bf16.mxu0 %v5416_v30 }
 0xc7a   :  { %5419 = vmatpush3.bf16.msra.mxu0 %v5416_v30 }
 0xd40   :  { %v5103_v34 = vpop.f32.mrb[2].mxu0 }
 0xd41   :  { %v2059_v35 = vadd.f32 %v5103_v34, %v2057_v33  ;;  %v2043_v36 = vpop.f32.mrb[3].mxu0  ;;  %v148_v34 = vld [vmem:[%s6417_s1 + $0x168] sm:$0xff] }
 0xd42   :  { %v2058_v37 = vadd.f32 %v2057_v33, %v2043_v36  ;;  %v5420_v33 = vpack.c.bf16 %v147_v9, %v146_v31  ;;  %v2324_v9 = vld [vmem:[%s6417_s1 + $0x1b0] sm:$0xff] }
 0xd43   :  { %v2061_v38 = vadd.f32 %v2059_v35, %v5730_v47  ;;  %v149_v35 = vld [vmem:[%s6417_s1 + $0x170] sm:$0xff] }
 0xd44   :  { %v2060_v39 = vadd.f32 %v2058_v37, %v5728_v46  ;;  %v156_v46 = vld [vmem:[%s6418_s2 + $0x20] sm:$0xff]  ;;  %5421 = vmatprep.subr.bf16.mxu0 %v5420_v33  ;;  %v5424_v36 = vpack.c.bf16 %v149_v35, %v148_v34  ;;  %v150_v37 = vld [vmem:[%s6417_s1 + $0x178] sm:$0xff] }
 0xd45   :  { %v2065_v40 = vsel %vm165_vm2, %v2061_v38, 0.0  ;;  %v5396_v8 = vpack.c.bf16 %v157_v50, %v156_v46  ;;  %5423 = vmatpush3.bf16.msra.mxu0 %v5420_v33  ;;  %v2325_v34 = vld [vmem:[%s6417_s1 + $0x1b8] sm:$0xff]  ;;  %v2326_v35 = vld [vmem:[%s6417_s1 + $0x1c0] sm:$0xff] }
 0xd46   :  { %2066 = vadd.xlane.f32.xlu0 %v2065_v40  ;;  %v2062_v3 = vsel %vm165_vm2, %v2060_v39, 0.0  ;;  %5425 = vmatprep.subr.bf16.mxu0 %v5424_v36  ;;  %v152_v40 = vld [vmem:[%s6417_s1 + $0x188] sm:$0xff] }
 0xd47   :  { %2063 = vadd.xlane.f32.xlu1 %v2062_v3  ;;  %5397 = vmatprep.subr.bf16.mxu1 %v5396_v8  ;;  %v153_v3 = vld [vmem:[%s6417_s1 + $0x190] sm:$0xff] }
 0xd48   :  { %5399 = vmatpush3.bf16.msra.mxu1 %v5396_v8 }
 0xd49   :  { %5401 = vmatprep.subr.bf16.mxu1 %v5400_v53  ;;  %5427 = vmatpush3.bf16.msra.mxu0 %v5424_v36  ;;  %v5440_v36 = vpack.c.bf16 %v2326_v35, %v2325_v34 }
 0xd4c   :  { %5403 = vmatpush3.bf16.msra.mxu1 %v5400_v53 }
 0xdd3   :  { %v2067_v41 = vpop.xlane.xlu0 %2066 }
 0xdd4   :  { %v2070_v4 = vmul.f32 0.03125, %v2067_v41  ;;  %v2064_v42 = vpop.xlane.xlu1 %2063  ;;  %v5432_v41 = vpack.c.bf16 %v153_v3, %v152_v40 }
 0xdd5   :  { %v2069_v43 = vmul.f32 0.03125, %v2064_v42 }
 0xdd6   :  { %v2072_v44 = vsub.f32 %v2061_v38, %v2070_v4  ;;  %v151_v38 = vld [vmem:[%s6417_s1 + $0x180] sm:$0xff] }
 0xdd7   :  { %v2071_v45 = vsub.f32 %v2060_v39, %v2069_v43  ;;  %v5428_v39 = vpack.c.bf16 %v151_v38, %v150_v37  ;;  %v4692_v4 = vld [vmem:[%s6418_s2 + $0x40] ss:$0 sm:$0xff]  ;;  %v2327_v37 = vld [vmem:[%s6417_s1 + $0x1c8] sm:$0xff]  ;;  %v2328_v38 = vld [vmem:[%s6417_s1 + $0x1d0] sm:$0xff] }
 0xdd8   :  { %v2074_v48 = vmul.f32 %v2072_v44, %v2072_v44 }
 0xdd9   :  { %v2073_v49 = vmul.f32 %v2071_v45, %v2071_v45  ;;  %5429 = vmatprep.subr.bf16.mxu0 %v5428_v39 }
 0xdda   :  { %v2078_v6 = vsel %vm165_vm2, %v2074_v48, 0.0  ;;  %5431 = vmatpush3.bf16.msra.mxu0 %v5428_v39  ;;  %v5444_v39 = vpack.c.bf16 %v2328_v38, %v2327_v37 }
 0xddb   :  { %2079 = vadd.xlane.f32.xlu1 %v2078_v6  ;;  %v2075_v47 = vsel %vm165_vm2, %v2073_v49, 0.0  ;;  %5433 = vmatprep.subr.bf16.mxu0 %v5432_v41 }
 0xddc   :  { %2076 = vadd.xlane.f32.xlu0 %v2075_v47 }
 0xdde   :  { %5435 = vmatpush3.bf16.msra.mxu0 %v5432_v41 }
 0xddf   :  { %5193 = vmatprep.subr.mxu0 %v5622_v55 }
 0xe68   :  { %v2080_v62 = vpop.xlane.xlu1 %2079 }
 0xe69   :  { %v2082_v63 = vmul.f32 0.03125, %v2080_v62  ;;  %v2077_v0 = vpop.xlane.xlu0 %2076 }
 0xe6a   :  { %v2081_v1 = vmul.f32 0.03125, %v2077_v0 }
 0xe6b   :  { %v2084_v5 = vadd.f32 1e-05, %v2082_v63 }
 0xe6c   :  { %v2083_v7 = vadd.f32 1e-05, %v2081_v1 }
 0xe6d   :  { %5560 = vrsqrt.f32 %v2084_v5 }
 0xe6e   :  { %5562 = vrsqrt.f32 %v2083_v7  ;;  %v155_v7 = vld [vmem:[%s6417_s1 + $0x1a0] sm:$0xff] }
 0xe77   :  { %v5561_v14 = vpop.eup %5560 }
 0xe78   :  { %v5563_v15 = vpop.eup %5562  ;;  %v2088_v16 = vmul.f32 %v5561_v14, %v2072_v44 }
 0xe79   :  { %v2087_v17 = vmul.f32 %v5563_v15, %v2071_v45 }
 0xe7a   :  { %v2094_v19 = vmul.f32 %v2092_v13, %v2088_v16 }
 0xe7b   :  { %v2093_v20 = vmul.f32 %v2092_v13, %v2087_v17  ;;  %v2207_v13 = vrot.slane %v155_v7, %v5768_v61 }
 0xe7c   :  { %v5982_v22 = vadd.f32 %v2098_v18, %v2094_v19 }
 0xe7d   :  { %v5980_v21 = vadd.f32 %v2098_v18, %v2093_v20 }
 0xe7f   :  { %5112 = vmatprep.mubr.msk.f32.mxu1 %vm165_vm2, %v5980_v21 }
 0xe80   :  { %5113 = vmatmul.mubr.msk.f32.vlgmr.msra.gmra.mrb[32].mxu1 %vm165_vm2, %v5982_v22 }
 0xf53   :  { %v5114_v42 = vpop.f32.mrb[32].mxu1 }
 0xf54   :  { %v2183_v43 = vadd.f32 %v5114_v42, %v4692_v4  ;;  %v2177_v44 = vpop.f32.mrb[33].mxu1 }
 0xf55   :  { %v2178_v45 = vadd.f32 %v4692_v4, %v2177_v44  ;;  %v2313_v44 = vsub.s32 6, %v5759_v56 }
 0xf56   :  { %v2189_v48 = vmul.f32 0.044715, %v2183_v43  ;;  %v2187_v0 = vmul.f32 0.5, %v2183_v43 }
 0xf57   :  { %v2188_v49 = vmul.f32 0.044715, %v2178_v45  ;;  %v2186_v62 = vmul.f32 0.5, %v2178_v45 }
 0xf58   :  { %v2191_v6 = vmul.f32 %v2189_v48, %v2183_v43  ;;  %v2314_v48 = vrot.slane %v5765_v60, %v2313_v44 }
 0xf59   :  { %v2190_v47 = vmul.f32 %v2188_v49, %v2178_v45 }
 0xf5a   :  { %v2193_v46 = vmul.f32 %v2191_v6, %v2183_v43 }
 0xf5b   :  { %v2192_v50 = vmul.f32 %v2190_v47, %v2178_v45 }
 0xf5c   :  { %v2195_v8 = vadd.f32 %v2193_v46, %v2183_v43 }
 0xf5d   :  { %v2194_v51 = vadd.f32 %v2192_v50, %v2178_v45  ;;  %v2319_v45 = vsub.s32 7, %v5759_v56 }
 0xf5e   :  { %v2197_v52 = vmul.f32 0.7978846, %v2195_v8 }
 0xf5f   :  { %v2196_v53 = vmul.f32 0.7978846, %v2194_v51  ;;  %v2320_v50 = vrot.slane %v5765_v60, %v2319_v45  ;;  %v2331_v60 = vld [vmem:[%s6417_s1 + $0x1e8] sm:$0xff] }
 0xf60   :  { %5564 = vtanh.f32 %v2197_v52  ;;  %v2329_v52 = vld [vmem:[%s6417_s1 + $0x1d8] sm:$0xff] }
 0xf61   :  { %5566 = vtanh.f32 %v2196_v53  ;;  %v2330_v53 = vld [vmem:[%s6417_s1 + $0x1e0] sm:$0xff] }
 0xf6a   :  { %v5565_v54 = vpop.eup %5564 }
 0xf6b   :  { %v5567_v57 = vpop.eup %5566  ;;  %v2201_v58 = vadd.f32 1.0, %v5565_v54 }
 0xf6c   :  { %v2200_v63 = vadd.f32 1.0, %v5567_v57 }
 0xf6d   :  { %v2203_v5 = vmul.f32 %v2201_v58, %v2187_v0  ;;  %v5448_v58 = vpack.c.bf16 %v2330_v53, %v2329_v52  ;;  %v2333_v0 = vld [vmem:[%s6417_s1 + $0x1f8] sm:$0xff] }
 0xf6e   :  { %v2202_v1 = vmul.f32 %v2200_v63, %v2186_v62  ;;  %v2332_v62 = vld [vmem:[%s6417_s1 + $0x1f0] sm:$0xff] }
 0xf6f   :  { %v5452_v63 = vpack.c.bf16 %v2332_v62, %v2331_v60 }
 0xf70   :  { %5147 = vmatprep.mubr.f32.mxu0 %v2202_v1  ;;  %v2334_v1 = vld [vmem:[%s6417_s1 + $0x200] sm:$0xff] }
 0xf71   :  { %5148 = vmatmul.mubr.f32.vlgmr.msra.gmra.mrb[10].mxu0 %v2203_v5  ;;  %v5456_v5 = vpack.c.bf16 %v2334_v1, %v2333_v0 }
 0xf72   :  { %5195 = vmatprep.mubr.msk.f32.mxu0 %vm5623_vm3, %v5622_v55 }
0x1044   :  { %v5149_v14 = vpop.f32.mrb[10].mxu0 }
0x1045   :  { %v2280_v15 = vadd.f32 %v5149_v14, %v2207_v13  ;;  %v2274_v16 = vpop.f32.mrb[11].mxu0  ;;  %v6112_v14 = vld [vmem:[%s6417_s1 + $0x2a8] sm:$0xff] }
0x1046   :  { %v2275_v17 = vadd.f32 %v2274_v16, %v2207_v13 }
0x1047   :  { %v2284_v18 = vadd.f32 %v2280_v15, %v5982_v22  ;;  %v2450_v15 = vrot.slane %v6112_v14, %v249_v59 }
0x1048   :  { %v2283_v19 = vadd.f32 %v2275_v17, %v5980_v21  ;;  %v2323_v21 = vld [vmem:[%s6417_s1 + $0x1a8] sm:$0xff]  ;;  %v2365_v17 = vrot.slane %v6112_v14, %v5768_v61 }
0x1049   :  { %v2288_v20 = vsel %vm165_vm2, %v2284_v18, 0.0  ;;  %v5436_v33 = vpack.c.bf16 %v2324_v9, %v2323_v21 }
0x104a   :  { %2289 = vadd.xlane.f32.xlu1 %v2288_v20  ;;  %v2285_v23 = vsel %vm165_vm2, %v2283_v19, 0.0 }
0x104b   :  { %2286 = vadd.xlane.f32.xlu0 %v2285_v23  ;;  %5437 = vmatprep.subr.bf16.mxu1 %v5436_v33  ;;  %v2529_v23 = vrot.slane %v6112_v14, %v328_v2 }
0x104c   :  { %5439 = vmatpush3.bf16.msra.mxu1 %v5436_v33 }
0x104d   :  { %5441 = vmatprep.subr.bf16.mxu1 %v5440_v36 }
0x1050   :  { %5443 = vmatpush3.bf16.msra.mxu1 %v5440_v36 }
0x1051   :  { %5445 = vmatprep.subr.bf16.mxu1 %v5444_v39 }
0x10d7   :  { %v2290_v24 = vpop.xlane.xlu1 %2289 }
0x10d8   :  { %v2292_v11 = vmul.f32 0.03125, %v2290_v24  ;;  %v2287_v25 = vpop.xlane.xlu0 %2286 }
0x10d9   :  { %v2291_v26 = vmul.f32 0.03125, %v2287_v25 }
0x10da   :  { %v2294_v27 = vsub.f32 %v2284_v18, %v2292_v11 }
0x10db   :  { %v2293_v28 = vsub.f32 %v2283_v19, %v2291_v26 }
0x10dc   :  { %v2296_v29 = vmul.f32 %v2294_v27, %v2294_v27 }
0x10dd   :  { %v2295_v30 = vmul.f32 %v2293_v28, %v2293_v28 }
0x10de   :  { %v2300_v31 = vsel %vm165_vm2, %v2296_v29, 0.0 }
0x10df   :  { %2301 = vadd.xlane.f32.xlu1 %v2300_v31  ;;  %v2297_v22 = vsel %vm165_vm2, %v2295_v30, 0.0 }
0x10e0   :  { %2298 = vadd.xlane.f32.xlu0 %v2297_v22 }
0x116c   :  { %v2302_v40 = vpop.xlane.xlu1 %2301 }
0x116d   :  { %v2304_v3 = vmul.f32 0.03125, %v2302_v40  ;;  %v2299_v41 = vpop.xlane.xlu0 %2298 }
0x116e   :  { %v2303_v4 = vmul.f32 0.03125, %v2299_v41 }
0x116f   :  { %v2306_v42 = vadd.f32 1e-05, %v2304_v3 }
0x1170   :  { %v2305_v43 = vadd.f32 1e-05, %v2303_v4 }
0x1171   :  { %5568 = vrsqrt.f32 %v2306_v42 }
0x1172   :  { %5570 = vrsqrt.f32 %v2305_v43 }
0x117b   :  { %v5569_v49 = vpop.eup %5568 }
0x117c   :  { %v5571_v6 = vpop.eup %5570  ;;  %v2310_v47 = vmul.f32 %v5569_v49, %v2294_v27 }
0x117d   :  { %v2309_v46 = vmul.f32 %v5571_v6, %v2293_v28 }
0x117e   :  { %v2316_v8 = vmul.f32 %v2314_v48, %v2310_v47 }
0x117f   :  { %v2315_v51 = vmul.f32 %v2314_v48, %v2309_v46 }
0x1180   :  { %v6080_v57 = vadd.f32 %v2320_v50, %v2316_v8 }
0x1181   :  { %v6078_v54 = vadd.f32 %v2320_v50, %v2315_v51 }
0x1183   :  { %5158 = vmatprep.mubr.msk.f32.mxu1 %vm165_vm2, %v6078_v54 }
0x1184   :  { %5159 = vmatmul.mubr.msk.f32.vlgmr.msra.gmra.mrb[34].mxu1 %vm165_vm2, %v6080_v57 }
0x1185   :  { %5447 = vmatpush3.bf16.msra.mxu1 %v5444_v39  ;;  %5169 = vmatprep.mubr.msk.f32.mxu1 %vm165_vm2, %v6078_v54 }
0x1186   :  { %5449 = vmatprep.subr.bf16.mxu1 %v5448_v58 }
0x1189   :  { %5451 = vmatpush3.bf16.msra.mxu1 %v5448_v58 }
0x118a   :  { %5453 = vmatprep.subr.bf16.mxu1 %v5452_v63 }
0x118c   :  { %5170 = vmatmul.mubr.msk.f32.vlgmr.msra.gmra.mrb[36].mxu1 %vm165_vm2, %v6080_v57 }
0x118d   :  { %5455 = vmatpush3.bf16.msra.mxu1 %v5452_v63  ;;  %5180 = vmatprep.mubr.msk.f32.mxu1 %vm165_vm2, %v6078_v54 }
0x118e   :  { %5457 = vmatprep.subr.bf16.mxu1 %v5456_v5 }
0x1191   :  { %5459 = vmatpush3.bf16.msra.mxu1 %v5456_v5 }
0x1192   :  { %5183 = vmatprep.subr.mxu1 %v5622_v55 }
0x1194   :  { %5181 = vmatmul.mubr.msk.f32.vlgmr.msra.gmra.mrb[38].mxu1 %vm165_vm2, %v6080_v57 }
0x1195   :  { %5185 = vmatprep.mubr.msk.f32.mxu1 %vm5623_vm3, %v5622_v55 }
0x1257   :  { %v5160_v7 = vpop.f32.mrb[34].mxu1 }
0x1258   :  { %v2438_v13 = vpop.f32.mrb[35].mxu1  ;;  %v6137_v11 = vadd.f32 %v5160_v7, %v2365_v17 }
0x1259   :  { %v6123_v20 = vadd.f32 %v2438_v13, %v2365_v17 }
0x125f   :  { %v5171_v16 = vpop.f32.mrb[36].mxu1 }
0x1260   :  { %v2517_v18 = vpop.f32.mrb[37].mxu1  ;;  %v6129_v24 = vadd.f32 %v5171_v16, %v2450_v15 }
0x1261   :  { %v6119_v19 = vadd.f32 %v2517_v18, %v2450_v15 }
0x1263   :  { %5184 = vmatpush3.xpose.msk.msra.mxu1 %vm405_vm4, %v6119_v19 }
0x1264   :  { %5188 = vmatprep.subr.mxu1 %v5622_v55 }
0x1266   :  { %5186 = vmatmul.mubr.msk.f32.vlgmr.msra.gmra.mrb[40].mxu1 %vm405_vm4, %v6123_v20 }
0x1267   :  { %v5182_v59 = vpop.f32.mrb[38].mxu1  ;;  %5189 = vmatpush3.xpose.msk.msra.mxu1 %vm405_vm4, %v6129_v24  ;;  %5190 = vmatprep.mubr.msk.f32.mxu1 %vm5623_vm3, %v5622_v55 }
0x1268   :  { %v6139_v25 = vadd.f32 %v5182_v59, %v2529_v23  ;;  %v2596_v26 = vpop.f32.mrb[39].mxu1  ;;  %5198 = vmatprep.subr.mxu1 %v5622_v55 }
0x1269   :  { %v6142_v2 = vadd.f32 %v2596_v26, %v2529_v23 }
0x126a   :  { %5191 = vmatmul.mubr.msk.f32.vlgmr.msra.gmra.mrb[42].mxu1 %vm405_vm4, %v6137_v11 }
0x126b   :  { %5194 = vmatpush3.msra.mxu0 %v6142_v2  ;;  %5199 = vmatpush3.msra.mxu1 %v6139_v25 }
0x126c   :  { %5200 = vmatprep.mubr.msk.f32.mxu1 %vm5623_vm3, %v5622_v55  ;;  %5208 = vmatprep.subr.mxu1 %v5622_v55 }
0x126d   :  { %5203 = vmatprep.subr.mxu0 %v5622_v55 }
0x1339   :  { %v2677_v27 = vpop.f32.mrb[40].mxu1 }
0x133a   :  { %v5187_v28 = vpop.f32.mrb[41].mxu1  ;;  %v2757_v35 = vsel %vm405_vm4, %v2677_v27, -inf }
0x133d   :  { %v2753_v29 = vpop.f32.mrb[42].mxu1 }
0x133e   :  { %v5192_v30 = vpop.f32.mrb[43].mxu1  ;;  %v2760_v31 = vsel %vm405_vm4, %v2753_v29, -inf }
0x133f   :  { %2761 = vmax.xlane.f32.xlu0 %v2760_v31 }
0x1355   :  { %3007 = vrot.lane.b32.xlu0 %v6129_v24, %s5624_s20 }
0x13cc   :  { %v2762_v22 = vpop.xlane.xlu0 %2761 }
0x13cd   :  { %v2764_v21 = vsub.f32 %v2753_v29, %v2762_v22 }
0x13cf   :  { %v2767_v9 = vmul.f32 1.442695, %v2764_v21 }
0x13d0   :  { %v3008_v39 = vpop.permute.xlu0 %3007 }
0x13d1   :  { %5572 = vpow2.f32 %v2767_v9 }
0x13db   :  { %v5573_v33 = vpop.eup %5572 }
0x13dc   :  { %v2772_v34 = vsel %vm405_vm4, %v5573_v33, 0.0 }
0x13dd   :  { %2773 = vadd.xlane.f32.xlu1 %v2772_v34 }
0x13ee   :  { %3005 = vrot.lane.b32.xlu1 %v6137_v11, %s5624_s20 }
0x1412   :  { %2758 = vmax.xlane.f32.xlu1 %v2757_v35 }
0x1423   :  { %2927 = vrot.lane.b32.xlu1 %v6123_v20, %s5624_s20 }
0x146a   :  { %v2774_v36 = vpop.xlane.xlu1 %2773 }
0x146b   :  { %5574 = vrcp.f32 %v2774_v36 }
0x146e   :  { %v3006_v40 = vpop.permute.xlu1 %3005 }
0x1475   :  { %v5575_v37 = vpop.eup %5574 }
0x1476   :  { %v2780_v38 = vmul.f32 %v5575_v37, %v5573_v33 }
0x1478   :  { %5201 = vmatmul.mubr.msk.f32.vlgmr.msra.gmra.mrb[44].mxu1 %vm405_vm4, %v2780_v38 }
0x1479   :  { %5209 = vmatpush3.xpose.msk.msra.mxu1 %vm405_vm4, %v3008_v39  ;;  %5210 = vmatprep.mubr.msk.f32.mxu1 %vm5623_vm3, %v5622_v55 }
0x147a   :  { %5218 = vmatprep.subr.mxu1 %v5622_v55 }
0x147c   :  { %5211 = vmatmul.mubr.msk.f32.vlgmr.msra.gmra.mrb[46].mxu1 %vm405_vm4, %v3006_v40  ;;  %v2336_v40 = vld [vmem:[%s6417_s1 + $0x210] sm:$0xff] }
0x147d   :  { %5220 = vmatprep.mubr.msk.f32.mxu1 %vm5623_vm3, %v5622_v55 }
0x149f   :  { %v2759_v3 = vpop.xlane.xlu1 %2758 }
0x14a0   :  { %v2763_v41 = vsub.f32 %v2677_v27, %v2759_v3  ;;  %v2335_v3 = vld [vmem:[%s6417_s1 + $0x208] sm:$0xff] }
0x14a2   :  { %v2765_v4 = vmul.f32 1.442695, %v2763_v41 }
0x14a3   :  { %v2928_v8 = vpop.permute.xlu1 %2927 }
0x14a4   :  { %5576 = vpow2.f32 %v2765_v4 }
0x14ae   :  { %v5577_v42 = vpop.eup %5576 }
0x14af   :  { %v2769_v43 = vsel %vm405_vm4, %v5577_v42, 0.0 }
0x14b0   :  { %2770 = vadd.xlane.f32.xlu0 %v2769_v43 }
0x14c6   :  { %2929 = vrot.lane.b32.xlu0 %v6119_v19, %s5624_s20 }
0x153d   :  { %v2771_v48 = vpop.xlane.xlu0 %2770 }
0x153e   :  { %5578 = vrcp.f32 %v2771_v48 }
0x1541   :  { %v2930_v47 = vpop.permute.xlu0 %2929 }
0x1548   :  { %v5579_v49 = vpop.eup %5578 }
0x1549   :  { %v2779_v6 = vmul.f32 %v5579_v49, %v5577_v42 }
0x154b   :  { %5196 = vmatmul.mubr.msk.f32.vlgmr.msra.gmra.mrb[12].mxu0 %vm405_vm4, %v2779_v6  ;;  %v6173_v46 = vpop.f32.mrb[44].mxu1 }
0x154c   :  { %5204 = vmatpush3.xpose.msk.msra.mxu0 %vm405_vm4, %v2930_v47  ;;  %v5202_v50 = vpop.f32.mrb[45].mxu1  ;;  %5205 = vmatprep.mubr.msk.f32.mxu0 %vm5623_vm3, %v5622_v55 }
0x154d   :  { %5213 = vmatprep.subr.mxu0 %v5622_v55 }
0x154f   :  { %5206 = vmatmul.mubr.msk.f32.vlgmr.msra.gmra.mrb[14].mxu0 %vm405_vm4, %v2928_v8  ;;  %v3079_v51 = vpop.f32.mrb[46].mxu1 }
0x1550   :  { %v5212_v52 = vpop.f32.mrb[47].mxu1  ;;  %v3086_v53 = vsel %vm405_vm4, %v3079_v51, -inf  ;;  %5215 = vmatprep.mubr.msk.f32.mxu0 %vm5623_vm3, %v5622_v55 }
0x1551   :  { %3087 = vmax.xlane.f32.xlu1 %v3086_v53  ;;  %v2337_v53 = vld [vmem:[%s6417_s1 + $0x218] sm:$0xff] }
0x1562   :  { %3425 = vrot.lane.b32.xlu1 %v6119_v19, %s5625_s21 }
0x1566   :  { %3423 = vrot.lane.b32.xlu1 %v6123_v20, %s5625_s21 }
0x156a   :  { %3501 = vrot.lane.b32.xlu1 %v6137_v11, %s5625_s21 }
0x15de   :  { %v3088_v58 = vpop.xlane.xlu1 %3087 }
0x15df   :  { %v3090_v60 = vsub.f32 %v3079_v51, %v3088_v58 }
0x15e1   :  { %v3093_v62 = vmul.f32 1.442695, %v3090_v60 }
0x15e2   :  { %v3426_v18 = vpop.permute.xlu1 %3425 }
0x15e3   :  { %5580 = vpow2.f32 %v3093_v62 }
0x15ed   :  { %v5581_v63 = vpop.eup %5580 }
0x15ee   :  { %v3098_v0 = vsel %vm405_vm4, %v5581_v63, 0.0 }
0x15ef   :  { %3099 = vadd.xlane.f32.xlu0 %v3098_v0 }
0x1605   :  { %3185 = vrot.lane.b32.xlu0 %v6139_v25, %s5624_s20 }
0x1609   :  { %3503 = vrot.lane.b32.xlu0 %v6129_v24, %s5625_s21 }
0x161e   :  { %v6194_v1 = vpop.f32.mrb[12].mxu0 }
0x161f   :  { %v5197_v5 = vpop.f32.mrb[13].mxu0 }
0x1622   :  { %v3001_v7 = vpop.f32.mrb[14].mxu0 }
0x1623   :  { %v5207_v13 = vpop.f32.mrb[15].mxu0  ;;  %v3083_v15 = vsel %vm405_vm4, %v3001_v7, -inf }
0x1628   :  { %3084 = vmax.xlane.f32.xlu0 %v3083_v15 }
0x163e   :  { %3108 = vrot.lane.b32.xlu0 %v6142_v2, %s5624_s20 }
0x1642   :  { %3603 = vrot.lane.b32.xlu0 %v6142_v2, %s5625_s21 }
0x1646   :  { %3840 = vrot.lane.b32.xlu0 %v6119_v19, %s5626_s26  ;;  %v3424_v19 = vpop.permute.xlu1 %3423 }
0x164a   :  { %3918 = vrot.lane.b32.xlu0 %v6129_v24, %s5626_s26  ;;  %v3502_v24 = vpop.permute.xlu1 %3501 }
0x164e   :  { %3838 = vrot.lane.b32.xlu0 %v6123_v20, %s5626_s26 }
0x1652   :  { %3916 = vrot.lane.b32.xlu0 %v6137_v11, %s5626_s26 }
0x167c   :  { %v3100_v16 = vpop.xlane.xlu0 %3099 }
0x167d   :  { %5582 = vrcp.f32 %v3100_v16 }
0x1680   :  { %v3186_v17 = vpop.permute.xlu0 %3185 }
0x1681   :  { %5219 = vmatpush3.msra.mxu1 %v3186_v17 }
0x1682   :  { %5233 = vmatprep.subr.mxu1 %v5622_v55 }
0x1684   :  { %v3504_v20 = vpop.permute.xlu0 %3503 }
0x1687   :  { %v5583_v23 = vpop.eup %5582 }
0x1688   :  { %v3106_v59 = vmul.f32 %v5583_v23, %v5581_v63 }
0x168a   :  { %5221 = vmatmul.mubr.msk.f32.vlgmr.msra.gmra.mrb[48].mxu1 %vm405_vm4, %v3106_v59 }
0x168b   :  { %5234 = vmatpush3.xpose.msk.msra.mxu1 %vm405_vm4, %v3426_v18  ;;  %5235 = vmatprep.mubr.msk.f32.mxu1 %vm5623_vm3, %v5622_v55 }
0x168c   :  { %5238 = vmatprep.subr.mxu1 %v5622_v55 }
0x168e   :  { %5236 = vmatmul.mubr.msk.f32.vlgmr.msra.gmra.mrb[50].mxu1 %vm405_vm4, %v3424_v19 }
0x168f   :  { %5239 = vmatpush3.xpose.msk.msra.mxu1 %vm405_vm4, %v3504_v20  ;;  %5240 = vmatprep.mubr.msk.f32.mxu1 %vm5623_vm3, %v5622_v55 }
0x1690   :  { %5248 = vmatprep.subr.mxu1 %v5622_v55 }
0x1692   :  { %5241 = vmatmul.mubr.msk.f32.vlgmr.msra.gmra.mrb[52].mxu1 %vm405_vm4, %v3502_v24 }
0x1693   :  { %5250 = vmatprep.mubr.msk.f32.mxu1 %vm5623_vm3, %v5622_v55 }
0x16b5   :  { %v3085_v11 = vpop.xlane.xlu0 %3084 }
0x16b6   :  { %v3089_v26 = vsub.f32 %v3001_v7, %v3085_v11 }
0x16b8   :  { %v3091_v27 = vmul.f32 1.442695, %v3089_v26 }
0x16b9   :  { %v3109_v28 = vpop.permute.xlu0 %3108 }
0x16ba   :  { %5584 = vpow2.f32 %v3091_v27  ;;  %5214 = vmatpush3.msra.mxu0 %v3109_v28 }
0x16bb   :  { %5223 = vmatprep.subr.mxu0 %v2336_v40 }
0x16bd   :  { %v3604_v58 = vpop.permute.xlu0 %3603 }
0x16c1   :  { %v3841_v0 = vpop.permute.xlu0 %3840 }
0x16c4   :  { %v5585_v29 = vpop.eup %5584 }
0x16c5   :  { %v3095_v30 = vsel %vm405_vm4, %v5585_v29, 0.0 }
0x16c6   :  { %3096 = vadd.xlane.f32.xlu1 %v3095_v30 }
0x1753   :  { %v3097_v31 = vpop.xlane.xlu1 %3096 }
0x1754   :  { %5586 = vrcp.f32 %v3097_v31 }
0x175d   :  { %v3257_v22 = vpop.f32.mrb[48].mxu1 }
0x175e   :  { %v5587_v21 = vpop.eup %5586  ;;  %v5222_v9 = vpop.f32.mrb[49].mxu1 }
0x175f   :  { %v3105_v33 = vmul.f32 %v5587_v21, %v5585_v29 }
0x1761   :  { %5216 = vmatmul.mubr.msk.f32.vlgmr.msra.gmra.mrb[16].mxu0 %vm405_vm4, %v3105_v33  ;;  %v3497_v34 = vpop.f32.mrb[50].mxu1 }
0x1762   :  { %v5237_v35 = vpop.f32.mrb[51].mxu1  ;;  %v3579_v36 = vsel %vm405_vm4, %v3497_v34, -inf  ;;  %5224 = vmatpush3.msra.mxu0 %v2336_v40 }
0x1763   :  { %3580 = vmax.xlane.f32.xlu1 %v3579_v36  ;;  %5228 = vmatprep.subr.mxu0 %v2335_v3 }
0x1765   :  { %v3575_v37 = vpop.f32.mrb[52].mxu1 }
0x1766   :  { %v5242_v38 = vpop.f32.mrb[53].mxu1  ;;  %v3582_v39 = vsel %vm405_vm4, %v3575_v37, -inf }
0x1767   :  { %3583 = vmax.xlane.f32.xlu1 %v3582_v39  ;;  %v2338_v39 = vld [vmem:[%s6417_s1 + $0x220] sm:$0xff] }
0x17f0   :  { %v3581_v41 = vpop.xlane.xlu1 %3580 }
0x17f1   :  { %v3585_v4 = vsub.f32 %v3497_v34, %v3581_v41 }
0x17f3   :  { %v3587_v42 = vmul.f32 1.442695, %v3585_v4 }
0x17f4   :  { %v3584_v43 = vpop.xlane.xlu1 %3583 }
0x17f5   :  { %5588 = vpow2.f32 %v3587_v42  ;;  %v3586_v48 = vsub.f32 %v3575_v37, %v3584_v43 }
0x17f7   :  { %v3589_v49 = vmul.f32 1.442695, %v3586_v48  ;;  %v4256_v48 = vrot.slane %v6112_v14, %v2056_v32 }
0x17f9   :  { %5590 = vpow2.f32 %v3589_v49 }
0x17ff   :  { %v5589_v6 = vpop.eup %5588 }
0x1800   :  { %v3591_v47 = vsel %vm405_vm4, %v5589_v6, 0.0 }
0x1801   :  { %3592 = vadd.xlane.f32.xlu1 %v3591_v47 }
0x1803   :  { %v5591_v50 = vpop.eup %5590 }
0x1804   :  { %v3594_v8 = vsel %vm405_vm4, %v5591_v50, 0.0 }
0x1805   :  { %3595 = vadd.xlane.f32.xlu1 %v3594_v8 }
0x1816   :  { %3679 = vrot.lane.b32.xlu1 %v6139_v25, %s5625_s21 }
0x1834   :  { %v3180_v51 = vpop.f32.mrb[16].mxu0 }
0x1835   :  { %v5217_v52 = vpop.f32.mrb[17].mxu0  ;;  %5225 = vmatprep.mubr.msk.f32.mxu0 %vm405_vm4, %v3180_v51 }
0x1836   :  { %5226 = vmatmul.mubr.msk.f32.vlgmr.msra.gmra.mrb[18].mxu0 %vm405_vm4, %v3257_v22 }
0x1837   :  { %5230 = vmatprep.mubr.msk.f32.mxu0 %vm405_vm4, %v6194_v1  ;;  %5229 = vmatpush3.msra.mxu0 %v2335_v3 }
0x1838   :  { %5243 = vmatprep.subr.mxu0 %v5622_v55 }
0x183e   :  { %5231 = vmatmul.mubr.msk.f32.vlgmr.msra.gmra.mrb[18].mxu0 %vm405_vm4, %v6173_v46  ;;  %v3919_v46 = vpop.permute.xlu0 %3918 }
0x183f   :  { %5244 = vmatpush3.msra.mxu0 %v3604_v58  ;;  %5245 = vmatprep.mubr.msk.f32.mxu0 %vm5623_vm3, %v5622_v55 }
0x1840   :  { %5253 = vmatprep.subr.mxu0 %v2337_v53 }
0x1842   :  { %v3839_v15 = vpop.permute.xlu0 %3838 }
0x1846   :  { %v3917_v59 = vpop.permute.xlu0 %3916 }
0x188e   :  { %v3593_v60 = vpop.xlane.xlu1 %3592 }
0x188f   :  { %5592 = vrcp.f32 %v3593_v60 }
0x1892   :  { %v3596_v62 = vpop.xlane.xlu1 %3595 }
0x1893   :  { %5594 = vrcp.f32 %v3596_v62 }
0x1896   :  { %v3680_v63 = vpop.permute.xlu1 %3679 }
0x1897   :  { %5249 = vmatpush3.msra.mxu1 %v3680_v63 }
0x1898   :  { %5258 = vmatprep.subr.mxu1 %v5622_v55 }
0x1899   :  { %v5593_v1 = vpop.eup %5592 }
0x189a   :  { %v3601_v5 = vmul.f32 %v5593_v1, %v5589_v6 }
0x189c   :  { %5246 = vmatmul.mubr.msk.f32.vlgmr.msra.gmra.mrb[20].mxu0 %vm405_vm4, %v3601_v5 }
0x189d   :  { %v5595_v7 = vpop.eup %5594  ;;  %5254 = vmatpush3.msra.mxu0 %v2337_v53 }
0x189e   :  { %v3602_v13 = vmul.f32 %v5595_v7, %v5591_v50  ;;  %5263 = vmatprep.subr.mxu0 %v5622_v55 }
0x18a0   :  { %5251 = vmatmul.mubr.msk.f32.vlgmr.msra.gmra.mrb[54].mxu1 %vm405_vm4, %v3602_v13 }
0x18a1   :  { %5259 = vmatpush3.xpose.msk.msra.mxu1 %vm405_vm4, %v3841_v0  ;;  %5260 = vmatprep.mubr.msk.f32.mxu1 %vm5623_vm3, %v5622_v55 }
0x18a2   :  { %5268 = vmatprep.subr.mxu1 %v5622_v55 }
0x18a4   :  { %5261 = vmatmul.mubr.msk.f32.vlgmr.msra.gmra.mrb[56].mxu1 %vm405_vm4, %v3839_v15  ;;  %v2359_v15 = vld [vmem:[%s6418_s2 + $0x58] sm:$0xff] }
0x18a5   :  { %5270 = vmatprep.mubr.msk.f32.mxu1 %vm5623_vm3, %v5622_v55 }
0x196f   :  { %v3675_v16 = vpop.f32.mrb[20].mxu0 }
0x1970   :  { %v5247_v17 = vpop.f32.mrb[21].mxu0  ;;  %5255 = vmatprep.mubr.msk.f32.mxu0 %vm405_vm4, %v3675_v16  ;;  %v2360_v16 = vld [vmem:[%s6418_s2 + $0x60] sm:$0xff] }
0x1971   :  { %v5464_v17 = vpack.c.bf16 %v2360_v16, %v2359_v15 }
0x1973   :  { %v3751_v18 = vpop.f32.mrb[54].mxu1 }
0x1974   :  { %v5252_v23 = vpop.f32.mrb[55].mxu1  ;;  %5256 = vmatmul.mubr.msk.f32.vlgmr.msra.gmra.mrb[18].mxu0 %vm405_vm4, %v3751_v18  ;;  %v2339_v18 = vld [vmem:[%s6417_s1 + $0x228] sm:$0xff] }
0x1975   :  { %5264 = vmatpush3.xpose.msk.msra.mxu0 %vm405_vm4, %v3919_v46  ;;  %5265 = vmatprep.mubr.msk.f32.mxu0 %vm5623_vm3, %v5622_v55  ;;  %v2358_v46 = vld [vmem:[%s6418_s2 + $0x50] sm:$0xff] }
0x1976   :  { %5273 = vmatprep.subr.mxu0 %v5622_v55  ;;  %v2340_v23 = vld [vmem:[%s6417_s1 + $0x230] sm:$0xff] }
0x1977   :  { %v3912_v19 = vpop.f32.mrb[56].mxu1 }
0x1978   :  { %v5262_v20 = vpop.f32.mrb[57].mxu1  ;;  %5266 = vmatmul.mubr.msk.f32.vlgmr.msra.gmra.mrb[22].mxu0 %vm405_vm4, %v3917_v59  ;;  %v3994_v24 = vsel %vm405_vm4, %v3912_v19, -inf  ;;  %v5468_v59 = vpack.c.bf16 %v2340_v23, %v2339_v18 }
0x1979   :  { %3995 = vmax.xlane.f32.xlu1 %v3994_v24  ;;  %5275 = vmatprep.mubr.msk.f32.mxu0 %vm5623_vm3, %v5622_v55 }
0x1a06   :  { %v3996_v11 = vpop.xlane.xlu1 %3995 }
0x1a07   :  { %v4000_v26 = vsub.f32 %v3912_v19, %v3996_v11 }
0x1a09   :  { %v4002_v27 = vmul.f32 1.442695, %v4000_v26 }
0x1a0b   :  { %5596 = vpow2.f32 %v4002_v27 }
0x1a15   :  { %v5597_v31 = vpop.eup %5596 }
0x1a16   :  { %v4006_v22 = vsel %vm405_vm4, %v5597_v31, 0.0 }
0x1a4b   :  { %v3990_v28 = vpop.f32.mrb[22].mxu0 }
0x1a4c   :  { %v5267_v29 = vpop.f32.mrb[23].mxu0  ;;  %v3997_v30 = vsel %vm405_vm4, %v3990_v28, -inf }
0x1a4d   :  { %3998 = vmax.xlane.f32.xlu0 %v3997_v30 }
0x1a51   :  { %4007 = vadd.xlane.f32.xlu0 %v4006_v22 }
0x1a67   :  { %4018 = vrot.lane.b32.xlu0 %v6142_v2, %s5626_s26 }
0x1ada   :  { %v3999_v21 = vpop.xlane.xlu0 %3998 }
0x1adb   :  { %v4001_v9 = vsub.f32 %v3990_v28, %v3999_v21  ;;  %v4290_v28 = vrot.slane %v6112_v14, %v2091_v10  ;;  %v4296_v21 = vrot.slane %v6112_v14, %v2097_v12  ;;  %v2341_v10 = vld [vmem:[%s6417_s1 + $0x238] sm:$0xff]  ;;  %v2342_v12 = vld [vmem:[%s6417_s1 + $0x240] sm:$0xff] }
0x1add   :  { %v4004_v33 = vmul.f32 1.442695, %v4001_v9 }
0x1ade   :  { %v4008_v55 = vpop.xlane.xlu0 %4007 }
0x1adf   :  { %5598 = vpow2.f32 %v4004_v33 }
0x1ae0   :  { %5600 = vrcp.f32 %v4008_v55 }
0x1ae2   :  { %v4019_v34 = vpop.permute.xlu0 %4018 }
0x1ae3   :  { %5269 = vmatpush3.msra.mxu1 %v4019_v34 }
0x1ae9   :  { %v5599_v35 = vpop.eup %5598 }
0x1aea   :  { %v5601_v36 = vpop.eup %5600  ;;  %v4009_v37 = vsel %vm405_vm4, %v5599_v35, 0.0 }
0x1aeb   :  { %v4016_v38 = vmul.f32 %v5601_v36, %v5597_v31  ;;  %4010 = vadd.xlane.f32.xlu1 %v4009_v37  ;;  %v2343_v36 = vld [vmem:[%s6417_s1 + $0x248] sm:$0xff]  ;;  %v2344_v37 = vld [vmem:[%s6417_s1 + $0x250] sm:$0xff] }
0x1aed   :  { %5271 = vmatmul.mubr.msk.f32.vlgmr.msra.gmra.mrb[58].mxu1 %vm405_vm4, %v4016_v38  ;;  %v5476_v38 = vpack.c.bf16 %v2344_v37, %v2343_v36 }
0x1afc   :  { %4094 = vrot.lane.b32.xlu1 %v6139_v25, %s5626_s26 }
0x1b78   :  { %v4011_v2 = vpop.xlane.xlu1 %4010 }
0x1b79   :  { %5602 = vrcp.f32 %v4011_v2  ;;  %v2345_v2 = vld [vmem:[%s6417_s1 + $0x258] sm:$0xff] }
0x1b7c   :  { %v4095_v40 = vpop.permute.xlu1 %4094 }
0x1b7d   :  { %5274 = vmatpush3.msra.mxu0 %v4095_v40 }
0x1b7e   :  { %5278 = vmatprep.subr.mxu0 %v2338_v39 }
0x1b83   :  { %v5603_v3 = vpop.eup %5602 }
0x1b84   :  { %v4017_v41 = vmul.f32 %v5603_v3, %v5599_v35  ;;  %v5472_v35 = vpack.c.bf16 %v2342_v12, %v2341_v10  ;;  %v2347_v3 = vld [vmem:[%s6417_s1 + $0x268] sm:$0xff] }
0x1b86   :  { %5276 = vmatmul.mubr.msk.f32.vlgmr.msra.gmra.mrb[24].mxu0 %vm405_vm4, %v4017_v41  ;;  %v2348_v41 = vld [vmem:[%s6417_s1 + $0x270] sm:$0xff] }
0x1b87   :  { %5279 = vmatpush3.msra.mxu0 %v2338_v39  ;;  %v2346_v39 = vld [vmem:[%s6417_s1 + $0x260] sm:$0xff] }
0x1b88   :  { %5469 = vmatprep.subr.bf16.mxu0 %v5468_v59  ;;  %v5480_v40 = vpack.c.bf16 %v2346_v39, %v2345_v2 }
0x1bc0   :  { %v4090_v4 = vpop.f32.mrb[58].mxu1 }
0x1bc1   :  { %v5272_v42 = vpop.f32.mrb[59].mxu1  ;;  %5280 = vmatprep.mubr.msk.f32.mxu0 %vm405_vm4, %v4090_v4  ;;  %v5484_v4 = vpack.c.bf16 %v2348_v41, %v2347_v3  ;;  %v4512_v41 = vrot.slane %v6112_v14, %v2313_v44 }
0x1bc2   :  { %v2349_v42 = vld [vmem:[%s6417_s1 + $0x278] sm:$0xff] }
0x1c59   :  { %v4166_v43 = vpop.f32.mrb[24].mxu0 }
0x1c5a   :  { %v5277_v25 = vpop.f32.mrb[25].mxu0  ;;  %5281 = vmatmul.mubr.msk.f32.vlgmr.msra.gmra.mrb[18].mxu0 %vm405_vm4, %v4166_v43  ;;  %v2350_v43 = vld [vmem:[%s6417_s1 + $0x280] sm:$0xff] }
0x1c5b   :  { %5471 = vmatpush3.bf16.msra.mxu0 %v5468_v59  ;;  %v5488_v25 = vpack.c.bf16 %v2350_v43, %v2349_v42 }
0x1c5c   :  { %5473 = vmatprep.subr.bf16.mxu0 %v5472_v35 }
0x1c5f   :  { %5475 = vmatpush3.bf16.msra.mxu0 %v5472_v35 }
0x1c60   :  { %5477 = vmatprep.subr.bf16.mxu0 %v5476_v38 }
0x1c63   :  { %5479 = vmatpush3.bf16.msra.mxu0 %v5476_v38 }
0x1c64   :  { %5481 = vmatprep.subr.bf16.mxu0 %v5480_v40 }
0x1c67   :  { %5483 = vmatpush3.bf16.msra.mxu0 %v5480_v40 }
0x1c68   :  { %5485 = vmatprep.subr.bf16.mxu0 %v5484_v4 }
0x1c6b   :  { %5487 = vmatpush3.bf16.msra.mxu0 %v5484_v4 }
0x1c6c   :  { %5489 = vmatprep.subr.bf16.mxu0 %v5488_v25 }
0x1c6f   :  { %5491 = vmatpush3.bf16.msra.mxu0 %v5488_v25  ;;  %v4518_v25 = vrot.slane %v6112_v14, %v2319_v45 }
0x1d2d   :  { %v5282_v49 = vpop.f32.mrb[18].mxu0 }
0x1d2e   :  { %v4258_v6 = vadd.f32 %v5282_v49, %v4256_v48  ;;  %v4242_v47 = vpop.f32.mrb[19].mxu0  ;;  %v2352_v49 = vld [vmem:[%s6417_s1 + $0x290] sm:$0xff] }
0x1d2f   :  { %v4257_v50 = vadd.f32 %v4256_v48, %v4242_v47  ;;  %v2351_v48 = vld [vmem:[%s6417_s1 + $0x288] sm:$0xff]  ;;  %v2353_v47 = vld [vmem:[%s6417_s1 + $0x298] sm:$0xff] }
0x1d30   :  { %v4260_v8 = vadd.f32 %v4258_v6, %v6080_v57  ;;  %v5492_v6 = vpack.c.bf16 %v2352_v49, %v2351_v48 }
0x1d31   :  { %v4259_v51 = vadd.f32 %v4257_v50, %v6078_v54  ;;  %v2357_v54 = vld [vmem:[%s6418_s2 + $0x48] sm:$0xff]  ;;  %v2354_v50 = vld [vmem:[%s6417_s1 + $0x2a0] sm:$0xff] }
0x1d32   :  { %v4264_v52 = vsel %vm165_vm2, %v4260_v8, 0.0  ;;  %v5460_v13 = vpack.c.bf16 %v2358_v46, %v2357_v54  ;;  %5493 = vmatprep.subr.bf16.mxu0 %v5492_v6 }
0x1d33   :  { %4265 = vadd.xlane.f32.xlu0 %v4264_v52  ;;  %v4261_v53 = vsel %vm165_vm2, %v4259_v51, 0.0  ;;  %5495 = vmatpush3.bf16.msra.mxu0 %v5492_v6 }
0x1d34   :  { %4262 = vadd.xlane.f32.xlu1 %v4261_v53  ;;  %5461 = vmatprep.subr.bf16.mxu1 %v5460_v13 }
0x1d35   :  { %5463 = vmatpush3.bf16.msra.mxu1 %v5460_v13 }
0x1d36   :  { %5465 = vmatprep.subr.bf16.mxu1 %v5464_v17 }
0x1d39   :  { %5467 = vmatpush3.bf16.msra.mxu1 %v5464_v17 }
0x1dc0   :  { %v4266_v58 = vpop.xlane.xlu0 %4265 }
0x1dc1   :  { %v4268_v60 = vmul.f32 0.03125, %v4266_v58  ;;  %v4263_v62 = vpop.xlane.xlu1 %4262 }
0x1dc2   :  { %v4267_v63 = vmul.f32 0.03125, %v4263_v62 }
0x1dc3   :  { %v4270_v0 = vsub.f32 %v4260_v8, %v4268_v60  ;;  %v5496_v8 = vpack.c.bf16 %v2354_v50, %v2353_v47 }
0x1dc4   :  { %v4269_v32 = vsub.f32 %v4259_v51, %v4267_v63  ;;  %v4733_v51 = vld [vmem:[%s6418_s2 + $0x68] ss:$0 sm:$0xff] }
0x1dc5   :  { %v4272_v1 = vmul.f32 %v4270_v0, %v4270_v0  ;;  %5497 = vmatprep.subr.bf16.mxu0 %v5496_v8 }
0x1dc6   :  { %v4271_v5 = vmul.f32 %v4269_v32, %v4269_v32  ;;  %5499 = vmatpush3.bf16.msra.mxu0 %v5496_v8 }
0x1dc7   :  { %v4276_v7 = vsel %vm165_vm2, %v4272_v1, 0.0 }
0x1dc8   :  { %4277 = vadd.xlane.f32.xlu1 %v4276_v7  ;;  %v4273_v57 = vsel %vm165_vm2, %v4271_v5, 0.0 }
0x1dc9   :  { %4274 = vadd.xlane.f32.xlu0 %v4273_v57 }
0x1e55   :  { %v4278_v19 = vpop.xlane.xlu1 %4277 }
0x1e56   :  { %v4280_v20 = vmul.f32 0.03125, %v4278_v19  ;;  %v4275_v24 = vpop.xlane.xlu0 %4274 }
0x1e57   :  { %v4279_v11 = vmul.f32 0.03125, %v4275_v24 }
0x1e58   :  { %v4282_v26 = vadd.f32 1e-05, %v4280_v20  ;;  %v2356_v20 = vld [vmem:[%s6417_s1 + $0x2b0] sm:$0xff] }
0x1e59   :  { %v4281_v27 = vadd.f32 1e-05, %v4279_v11  ;;  %v4405_v24 = vrot.slane %v2356_v20, %v5768_v61 }
0x1e5a   :  { %5604 = vrsqrt.f32 %v4282_v26 }
0x1e5b   :  { %5606 = vrsqrt.f32 %v4281_v27 }
0x1e64   :  { %v5605_v29 = vpop.eup %5604 }
0x1e65   :  { %v5607_v30 = vpop.eup %5606  ;;  %v4286_v31 = vmul.f32 %v5605_v29, %v4270_v0 }
0x1e66   :  { %v4285_v22 = vmul.f32 %v5607_v30, %v4269_v32 }
0x1e67   :  { %v4292_v9 = vmul.f32 %v4290_v28, %v4286_v31 }
0x1e68   :  { %v4291_v33 = vmul.f32 %v4290_v28, %v4285_v22 }
0x1e69   :  { %v6319_v34 = vadd.f32 %v4296_v21, %v4292_v9 }
0x1e6a   :  { %v6317_v55 = vadd.f32 %v4296_v21, %v4291_v33 }
0x1e6c   :  { %5291 = vmatprep.mubr.msk.f32.mxu1 %vm165_vm2, %v6317_v55 }
0x1e6d   :  { %5292 = vmatmul.mubr.msk.f32.vlgmr.msra.gmra.mrb[60].mxu1 %vm165_vm2, %v6319_v34 }
0x1f40   :  { %v5293_v52 = vpop.f32.mrb[60].mxu1 }
0x1f41   :  { %v4381_v53 = vadd.f32 %v5293_v52, %v4733_v51  ;;  %v4375_v58 = vpop.f32.mrb[61].mxu1 }
0x1f42   :  { %v4376_v60 = vadd.f32 %v4733_v51, %v4375_v58 }
0x1f43   :  { %v4387_v62 = vmul.f32 0.044715, %v4381_v53  ;;  %v4385_v23 = vmul.f32 0.5, %v4381_v53 }
0x1f44   :  { %v4386_v63 = vmul.f32 0.044715, %v4376_v60  ;;  %v4384_v17 = vmul.f32 0.5, %v4376_v60 }
0x1f45   :  { %v4389_v0 = vmul.f32 %v4387_v62, %v4381_v53 }
0x1f46   :  { %v4388_v32 = vmul.f32 %v4386_v63, %v4376_v60 }
0x1f47   :  { %v4391_v1 = vmul.f32 %v4389_v0, %v4381_v53  ;;  %v4561_v0 = vld [vmem:[%s6418_s2] sm:$0xff] }
0x1f48   :  { %v4390_v5 = vmul.f32 %v4388_v32, %v4376_v60  ;;  %v4562_v32 = vld [vmem:[%s6418_s2 + $0x8] sm:$0xff] }
0x1f49   :  { %v4393_v7 = vadd.f32 %v4391_v1, %v4381_v53  ;;  %v5500_v1 = vpack.c.bf16 %v4562_v32, %v4561_v0 }
0x1f4a   :  { %v4392_v57 = vadd.f32 %v4390_v5, %v4376_v60  ;;  %v4563_v5 = vld [vmem:[%s6418_s2 + $0x10] sm:$0xff] }
0x1f4b   :  { %v4395_v54 = vmul.f32 0.7978846, %v4393_v7  ;;  %v4564_v7 = vld [vmem:[%s6418_s2 + $0x18] sm:$0xff]  ;;  %5501 = vmatprep.subr.bf16.mxu1 %v5500_v1 }
0x1f4c   :  { %v4394_v46 = vmul.f32 0.7978846, %v4392_v57  ;;  %v5504_v57 = vpack.c.bf16 %v4564_v7, %v4563_v5  ;;  %5503 = vmatpush3.bf16.msra.mxu1 %v5500_v1 }
0x1f4d   :  { %5608 = vtanh.f32 %v4395_v54 }
0x1f4e   :  { %5610 = vtanh.f32 %v4394_v46  ;;  %5505 = vmatprep.subr.bf16.mxu1 %v5504_v57 }
0x1f50   :  { %5507 = vmatpush3.bf16.msra.mxu1 %v5504_v57 }
0x1f57   :  { %v5609_v13 = vpop.eup %5608 }
0x1f58   :  { %v5611_v15 = vpop.eup %5610  ;;  %v4399_v16 = vadd.f32 1.0, %v5609_v13 }
0x1f59   :  { %v4398_v18 = vadd.f32 1.0, %v5611_v15 }
0x1f5a   :  { %v4401_v19 = vmul.f32 %v4399_v16, %v4385_v23  ;;  %v4736_v23 = vld [vmem:[%s6417_s1 + $0x90] ss:$0 sm:$0xff] }
0x1f5b   :  { %v4400_v59 = vmul.f32 %v4398_v18, %v4384_v17 }
0x1f5d   :  { %5326 = vmatprep.mubr.f32.mxu0 %v4400_v59 }
0x1f5e   :  { %5327 = vmatmul.mubr.f32.vlgmr.msra.gmra.mrb[26].mxu0 %v4401_v19 }
0x2031   :  { %v5328_v11 = vpop.f32.mrb[26].mxu0 }
0x2032   :  { %v4478_v26 = vadd.f32 %v5328_v11, %v4405_v24  ;;  %v4472_v27 = vpop.f32.mrb[27].mxu0 }
0x2033   :  { %v4473_v28 = vadd.f32 %v4472_v27, %v4405_v24  ;;  %v4737_v24 = vld [vmem:[%s6417_s1 + $0x91] ss:$0 sm:$0xff] }
0x2034   :  { %v4482_v29 = vadd.f32 %v4478_v26, %v6319_v34 }
0x2035   :  { %v4481_v30 = vadd.f32 %v4473_v28, %v6317_v55 }
0x2036   :  { %v4486_v31 = vsel %vm165_vm2, %v4482_v29, 0.0 }
0x2037   :  { %4487 = vadd.xlane.f32.xlu1 %v4486_v31  ;;  %v4483_v22 = vsel %vm165_vm2, %v4481_v30, 0.0 }
0x2038   :  { %4484 = vadd.xlane.f32.xlu0 %v4483_v22 }
0x20c4   :  { %v4488_v21 = vpop.xlane.xlu1 %4487 }
0x20c5   :  { %v4490_v9 = vmul.f32 0.03125, %v4488_v21  ;;  %v4485_v33 = vpop.xlane.xlu0 %4484 }
0x20c6   :  { %v4489_v10 = vmul.f32 0.03125, %v4485_v33 }
0x20c7   :  { %v4492_v12 = vsub.f32 %v4482_v29, %v4490_v9 }
0x20c8   :  { %v4491_v61 = vsub.f32 %v4481_v30, %v4489_v10 }
0x20c9   :  { %v4494_v35 = vmul.f32 %v4492_v12, %v4492_v12 }
0x20ca   :  { %v4493_v36 = vmul.f32 %v4491_v61, %v4491_v61 }
0x20cb   :  { %v4498_v37 = vsel %vm165_vm2, %v4494_v35, 0.0 }
0x20cc   :  { %4499 = vadd.xlane.f32.xlu1 %v4498_v37  ;;  %v4495_v34 = vsel %vm165_vm2, %v4493_v36, 0.0 }
0x20cd   :  { %4496 = vadd.xlane.f32.xlu0 %v4495_v34 }
0x2159   :  { %v4500_v55 = vpop.xlane.xlu1 %4499 }
0x215a   :  { %v4502_v38 = vmul.f32 0.03125, %v4500_v55  ;;  %v4497_v2 = vpop.xlane.xlu0 %4496 }
0x215b   :  { %v4501_v39 = vmul.f32 0.03125, %v4497_v2 }
0x215c   :  { %v4504_v40 = vadd.f32 1e-05, %v4502_v38 }
0x215d   :  { %v4503_v3 = vadd.f32 1e-05, %v4501_v39 }
0x215e   :  { %5612 = vrsqrt.f32 %v4504_v40 }
0x215f   :  { %5614 = vrsqrt.f32 %v4503_v3 }
0x2168   :  { %v5613_v4 = vpop.eup %5612 }
0x2169   :  { %v5615_v42 = vpop.eup %5614  ;;  %v4508_v43 = vmul.f32 %v5613_v4, %v4492_v12 }
0x216a   :  { %v4507_v48 = vmul.f32 %v5615_v42, %v4491_v61 }
0x216b   :  { %v4514_v49 = vmul.f32 %v4512_v41, %v4508_v43 }
0x216c   :  { %v4513_v6 = vmul.f32 %v4512_v41, %v4507_v48 }
0x216d   :  { %v4520_v47 = vadd.f32 %v4518_v25, %v4514_v49 }
0x216e   :  { %v4519_v50 = vadd.f32 %v4518_v25, %v4513_v6 }
0x216f   :  { %v4526_v8 = vsel %vm165_vm2, %v4520_v47, 0.0 }
0x2170   :  { %4527 = vadd.xlane.f32.xlu1 %v4526_v8  ;;  %v4523_v51 = vsel %vm165_vm2, %v4519_v50, 0.0 }
0x2171   :  { %4524 = vadd.xlane.f32.xlu0 %v4523_v51 }
0x21fd   :  { %v4528_v52 = vpop.xlane.xlu1 %4527 }
0x21fe   :  { %v4530_v44 = vmul.f32 0.03125, %v4528_v52  ;;  %v4525_v53 = vpop.xlane.xlu0 %4524 }
0x21ff   :  { %v4529_v58 = vmul.f32 0.03125, %v4525_v53 }
0x2200   :  { %v4532_v60 = vsub.f32 %v4520_v47, %v4530_v44 }
0x2201   :  { %v4531_v62 = vsub.f32 %v4519_v50, %v4529_v58 }
0x2202   :  { %v4534_v56 = vmul.f32 %v4532_v60, %v4532_v60 }
0x2203   :  { %v4533_v63 = vmul.f32 %v4531_v62, %v4531_v62 }
0x2204   :  { %v4538_v45 = vsel %vm165_vm2, %v4534_v56, 0.0 }
0x2205   :  { %4539 = vadd.xlane.f32.xlu1 %v4538_v45  ;;  %v4535_v14 = vsel %vm165_vm2, %v4533_v63, 0.0 }
0x2206   :  { %4536 = vadd.xlane.f32.xlu0 %v4535_v14 }
0x2292   :  { %v4540_v54 = vpop.xlane.xlu1 %4539 }
0x2293   :  { %v4542_v46 = vmul.f32 0.03125, %v4540_v54  ;;  %v4537_v13 = vpop.xlane.xlu0 %4536 }
0x2294   :  { %v4541_v15 = vmul.f32 0.03125, %v4537_v13 }
0x2295   :  { %v4544_v16 = vadd.f32 1e-05, %v4542_v46 }
0x2296   :  { %v4543_v17 = vadd.f32 1e-05, %v4541_v15 }
0x2297   :  { %5616 = vrsqrt.f32 %v4544_v16 }
0x2298   :  { %5618 = vrsqrt.f32 %v4543_v17 }
0x22a1   :  { %v5617_v18 = vpop.eup %5616 }
0x22a2   :  { %v5619_v59 = vpop.eup %5618  ;;  %v4548_v19 = vmul.f32 %v5617_v18, %v4532_v60 }
0x22a3   :  { %v4547_v20 = vmul.f32 %v5619_v59, %v4531_v62 }
0x22a4   :  { %v4554_v11 = vmul.f32 %v4736_v23, %v4548_v19 }
0x22a5   :  { %v4553_v26 = vmul.f32 %v4736_v23, %v4547_v20 }
0x22a6   :  { %v4560_v28 = vadd.f32 %v4737_v24, %v4554_v11 }
0x22a7   :  { %v4559_v27 = vadd.f32 %v4737_v24, %v4553_v26 }
0x22a9   :  { %5337 = vmatprep.mubr.msk.f32.mxu1 %vm165_vm2, %v4559_v27 }
0x22aa   :  { %5338 = vmatmul.mubr.msk.f32.vlgmr.msra.gmra.mrb[62].mxu1 %vm165_vm2, %v4560_v28 }
0x237d   :  { %v5339_v29 = vpop.f32.mrb[62].mxu1 }
0x237e   :  { %4647 = vst [vmem:[%s6419_s3 + $0x8] sm:$0xff] %v5339_v29  ;;  %v4637_v30 = vpop.f32.mrb[63].mxu1 }
0x237f   :  { %4646 = vst [vmem:[%s6419_s3] sm:$0xff] %v4637_v30 }

</bundles_post_ra>
